<compile_context>
chip_gen: v7x
topology: tpu7x:2x2x1
jax: 0.10.0
libtpu: 0.0.40
codegen_flags: <defaults>
</compile_context>

<pallas_src>
import jax
import jax.numpy as jnp
from jax.experimental import pallas as pl
from jax.experimental.pallas import tpu as pltpu


# ----------------------------- Pallas kernel --------------------------------
def vae_kernel(x_ref, eps_ref,
               w1_ref, b1_ref,
               wmulv_ref, bmulv_ref,
               w2_ref, b2_ref,
               w3_ref, b3_ref,
               out_ref):
    bf16 = jnp.bfloat16
    z_dim = eps_ref.shape[-1]

    # ---- encoder ----
    x = x_ref[...].astype(bf16)
    h = jnp.dot(x, w1_ref[...], preferred_element_type=jnp.float32) + b1_ref[...]
    h = jnp.maximum(h, 0.0)

    # fused [mu | logvar] projection: one MXU push instead of two
    mulv = (jnp.dot(h.astype(bf16), wmulv_ref[...],
                    preferred_element_type=jnp.float32) + bmulv_ref[...])
    z_mu = mulv[:, :z_dim]
    z_lv = mulv[:, z_dim:]

    # ---- reparameterization (f32 elementwise; exp rides the EUP slot) ----
    std = jnp.exp(z_lv * 0.5)
    x_sample = eps_ref[...] * std + z_mu

    # ---- decoder ----
    h2 = (jnp.dot(x_sample.astype(bf16), w2_ref[...],
                  preferred_element_type=jnp.float32) + b2_ref[...])
    h2 = jnp.maximum(h2, 0.0)
    logits = (jnp.dot(h2.astype(bf16), w3_ref[...],
                      preferred_element_type=jnp.float32) + b3_ref[...])
    out_ref[...] = jax.nn.sigmoid(logits).astype(out_ref.dtype)


# ----------------------------- wrapper ---------------------------------------
def vae_forward(x, eps, params, *, tb=128):
    """x: [B, D_in] f32, eps: [B, Z] f32 standard normal. Requires B % tb == 0."""
    B, D_in = x.shape
    Z = eps.shape[-1]
    hidden = params["w1"].shape[-1]

    args = (x, eps,
            params["w1"], params["b1"],
            params["wmulv"], params["bmulv"],
            params["w2"], params["b2"],
            params["w3"], params["b3"])

    grid = (pl.cdiv(B, tb),)

    def act_spec(d):
        # batch-tiled activations: tile i of the batch, full feature width
        return pl.BlockSpec((tb, d), lambda i: (i, 0))

    def resident_spec(a):
        # weights/biases: same block for every grid step -> stay VMEM-resident
        return pl.BlockSpec(a.shape, lambda i: (0, 0))

    in_specs = [act_spec(D_in), act_spec(Z)] + [resident_spec(a) for a in args[2:]]
    out_spec = pl.BlockSpec((tb, D_in), lambda i: (i, 0))

    flops = 2 * B * (D_in * hidden + hidden * (2 * Z) + Z * hidden + hidden * D_in)
    bytes_accessed = (sum(int(a.size) * a.dtype.itemsize for a in args)
                      + B * D_in * 4)  # + output
    cost = pl.CostEstimate(flops=flops,
                           transcendentals=B * (Z + D_in),
                           bytes_accessed=bytes_accessed)

    return pl.pallas_call(
        vae_kernel,
        out_shape=jax.ShapeDtypeStruct((B, D_in), jnp.float32),
        grid=grid,
        in_specs=in_specs,
        out_specs=out_spec,
        compiler_params=pltpu.CompilerParams(
            dimension_semantics=("parallel",),          # v7x: split tiles over 2 TCs
            vmem_limit_bytes=32 * 1024 * 1024),         # safe on v5e/v6e/v7x
        cost_estimate=cost,
    )(*args)


# ----------------------------- params / reference ----------------------------
def init_params(key, d_in, hidden, z_dim):
    ks = jax.random.split(key, 9)
    s1 = 1.0 / jnp.sqrt(d_in)
    s2 = 1.0 / jnp.sqrt(hidden)
    s3 = 1.0 / jnp.sqrt(z_dim)
    bf16 = jnp.bfloat16
    # mu / logvar projection weights are fused along the output axis: [H, 2*Z]
    return {
        "w1":    jax.random.uniform(ks[0], (d_in, hidden), jnp.float32, -s1, s1).astype(bf16),
        "b1":    jax.random.uniform(ks[1], (1, hidden), jnp.float32, -s1, s1),
        "wmulv": jax.random.uniform(ks[2], (hidden, 2 * z_dim), jnp.float32, -s2, s2).astype(bf16),
        "bmulv": jax.random.uniform(ks[3], (1, 2 * z_dim), jnp.float32, -s2, s2),
        "w2":    jax.random.uniform(ks[4], (z_dim, hidden), jnp.float32, -s3, s3).astype(bf16),
        "b2":    jax.random.uniform(ks[5], (1, hidden), jnp.float32, -s3, s3),
        "w3":    jax.random.uniform(ks[6], (hidden, d_in), jnp.float32, -s2, s2).astype(bf16),
        "b3":    jax.random.uniform(ks[7], (1, d_in), jnp.float32, -s2, s2),
    }


def vae_forward_ref(x, eps, p):
    """Pure-JAX reference with the same bf16-operand / f32-accumulate numerics."""
    bf16 = jnp.bfloat16
    z_dim = eps.shape[-1]
    h = jnp.maximum(jnp.dot(x.astype(bf16), p["w1"],
                            preferred_element_type=jnp.float32) + p["b1"], 0.0)
    mulv = jnp.dot(h.astype(bf16), p["wmulv"],
                   preferred_element_type=jnp.float32) + p["bmulv"]
    mu, lv = mulv[:, :z_dim], mulv[:, z_dim:]
    z = eps * jnp.exp(lv * 0.5) + mu
    h2 = jnp.maximum(jnp.dot(z.astype(bf16), p["w2"],
                             preferred_element_type=jnp.float32) + p["b2"], 0.0)
    return jax.nn.sigmoid(jnp.dot(h2.astype(bf16), p["w3"],
                                  preferred_element_type=jnp.float32) + p["b3"])


# ----------------------------- main ------------------------------------------
if __name__ == "__main__":
    # Lane-dense sizes (multiples of 128) per the perf review; still small.
    B, D_IN, HIDDEN, Z = 256, 128, 128, 128
    TB = 128                       # 2 batch tiles -> pipelined, megacore-splittable

    key = jax.random.PRNGKey(0)
    k_x, k_eps, k_p = jax.random.split(key, 3)

    x = jax.random.normal(k_x, (B, D_IN), jnp.float32)
    # eps ~ N(0,1), drawn deterministically outside the kernel
    # (mirrors torch.randn_like(std) in the reference forward).
    eps = jax.random.normal(k_eps, (B, Z), jnp.float32)
    params = init_params(k_p, D_IN, HIDDEN, Z)

    out = vae_forward(x, eps, params, tb=TB)
    out = jax.block_until_ready(out)

    ref = vae_forward_ref(x, eps, params)
    assert out.shape == (B, D_IN)
    assert bool(jnp.allclose(out, ref, atol=1e-3, rtol=1e-3)), \
        f"mismatch vs JAX reference, max abs err {float(jnp.max(jnp.abs(out - ref)))}"

    print("KERNEL_OK")
</pallas_src>

<mosaic_0001>
module attributes {stable_mosaic.version = 11 : i64} {
  func.func @vae_kernel(%arg0: i32, %arg1: memref<128x128xf32, #tpu.memory_space<vmem>>, %arg2: memref<128x128xf32, #tpu.memory_space<vmem>>, %arg3: memref<128x128xbf16, #tpu.memory_space<vmem>>, %arg4: memref<1x128xf32, #tpu.memory_space<vmem>>, %arg5: memref<128x256xbf16, #tpu.memory_space<vmem>>, %arg6: memref<1x256xf32, #tpu.memory_space<vmem>>, %arg7: memref<128x128xbf16, #tpu.memory_space<vmem>>, %arg8: memref<1x128xf32, #tpu.memory_space<vmem>>, %arg9: memref<128x128xbf16, #tpu.memory_space<vmem>>, %arg10: memref<1x128xf32, #tpu.memory_space<vmem>>, %arg11: memref<128x128xf32, #tpu.memory_space<vmem>>) attributes {dimension_semantics = [#tpu.dimension_semantics<parallel>], iteration_bounds = array<i64: 2>, scalar_prefetch = 0 : i64, scratch_operands = 0 : i64, tpu.core_type = #tpu.core_type<tc>, window_params = [{transform_indices = @transform_0, window_bounds = array<i64: 128, 128>}, {transform_indices = @transform_1, window_bounds = array<i64: 128, 128>}, {pipeline_mode = #tpu.pipeline_mode<synchronous>, transform_indices = @transform_2, window_bounds = array<i64: 128, 128>}, {pipeline_mode = #tpu.pipeline_mode<synchronous>, transform_indices = @transform_3, window_bounds = array<i64: 1, 128>}, {pipeline_mode = #tpu.pipeline_mode<synchronous>, transform_indices = @transform_4, window_bounds = array<i64: 128, 256>}, {pipeline_mode = #tpu.pipeline_mode<synchronous>, transform_indices = @transform_5, window_bounds = array<i64: 1, 256>}, {pipeline_mode = #tpu.pipeline_mode<synchronous>, transform_indices = @transform_6, window_bounds = array<i64: 128, 128>}, {pipeline_mode = #tpu.pipeline_mode<synchronous>, transform_indices = @transform_7, window_bounds = array<i64: 1, 128>}, {pipeline_mode = #tpu.pipeline_mode<synchronous>, transform_indices = @transform_8, window_bounds = array<i64: 128, 128>}, {pipeline_mode = #tpu.pipeline_mode<synchronous>, transform_indices = @transform_9, window_bounds = array<i64: 1, 128>}, {transform_indices = @transform_10, window_bounds = array<i64: 128, 128>}]} {
    %c0 = arith.constant 0 : index
    %c0_0 = arith.constant 0 : index
    %0 = vector.load %arg1[%c0, %c0_0] : memref<128x128xf32, #tpu.memory_space<vmem>>, vector<128x128xf32>
    %1 = arith.truncf %0 : vector<128x128xf32> to vector<128x128xbf16>
    %c0_1 = arith.constant 0 : index
    %c0_2 = arith.constant 0 : index
    %2 = vector.load %arg3[%c0_1, %c0_2] : memref<128x128xbf16, #tpu.memory_space<vmem>>, vector<128x128xbf16>
    %cst = arith.constant dense<0.000000e+00> : vector<128x128xf32>
    %3 = tpu.matmul %1, %2, %cst {dimension_numbers = #tpu.dot_dimension_numbers<[1], [0], [0], [1], [0, 0, 1, 1], [], []>} : vector<128x128xbf16>, vector<128x128xbf16>, vector<128x128xf32> -> vector<128x128xf32>
    %c0_3 = arith.constant 0 : index
    %c0_4 = arith.constant 0 : index
    %4 = vector.load %arg4[%c0_3, %c0_4] : memref<1x128xf32, #tpu.memory_space<vmem>>, vector<1x128xf32>
    %5 = vector.broadcast %4 : vector<1x128xf32> to vector<128x128xf32>
    %6 = arith.addf %3, %5 : vector<128x128xf32>
    %cst_5 = arith.constant 0.000000e+00 : f32
    %7 = vector.broadcast %cst_5 : f32 to vector<128x128xf32>
    %8 = arith.maximumf %6, %7 : vector<128x128xf32>
    %9 = arith.truncf %8 : vector<128x128xf32> to vector<128x128xbf16>
    %c0_6 = arith.constant 0 : index
    %c0_7 = arith.constant 0 : index
    %10 = vector.load %arg5[%c0_6, %c0_7] : memref<128x256xbf16, #tpu.memory_space<vmem>>, vector<128x256xbf16>
    %cst_8 = arith.constant dense<0.000000e+00> : vector<128x256xf32>
    %11 = tpu.matmul %9, %10, %cst_8 {dimension_numbers = #tpu.dot_dimension_numbers<[1], [0], [0], [1], [0, 0, 1, 1], [], []>} : vector<128x128xbf16>, vector<128x256xbf16>, vector<128x256xf32> -> vector<128x256xf32>
    %c0_9 = arith.constant 0 : index
    %c0_10 = arith.constant 0 : index
    %12 = vector.load %arg6[%c0_9, %c0_10] : memref<1x256xf32, #tpu.memory_space<vmem>>, vector<1x256xf32>
    %13 = vector.broadcast %12 : vector<1x256xf32> to vector<128x256xf32>
    %14 = arith.addf %11, %13 : vector<128x256xf32>
    %15 = vector.extract_strided_slice %14 {offsets = [0, 0], sizes = [128, 128], strides = [1, 1]} : vector<128x256xf32> to vector<128x128xf32>
    %16 = vector.extract_strided_slice %14 {offsets = [0, 128], sizes = [128, 128], strides = [1, 1]} : vector<128x256xf32> to vector<128x128xf32>
    %cst_11 = arith.constant 5.000000e-01 : f32
    %17 = vector.broadcast %cst_11 : f32 to vector<128x128xf32>
    %18 = arith.mulf %16, %17 : vector<128x128xf32>
    %19 = math.exp %18 : vector<128x128xf32>
    %c0_12 = arith.constant 0 : index
    %c0_13 = arith.constant 0 : index
    %20 = vector.load %arg2[%c0_12, %c0_13] : memref<128x128xf32, #tpu.memory_space<vmem>>, vector<128x128xf32>
    %21 = arith.mulf %20, %19 : vector<128x128xf32>
    %22 = arith.addf %21, %15 : vector<128x128xf32>
    %23 = arith.truncf %22 : vector<128x128xf32> to vector<128x128xbf16>
    %c0_14 = arith.constant 0 : index
    %c0_15 = arith.constant 0 : index
    %24 = vector.load %arg7[%c0_14, %c0_15] : memref<128x128xbf16, #tpu.memory_space<vmem>>, vector<128x128xbf16>
    %cst_16 = arith.constant dense<0.000000e+00> : vector<128x128xf32>
    %25 = tpu.matmul %23, %24, %cst_16 {dimension_numbers = #tpu.dot_dimension_numbers<[1], [0], [0], [1], [0, 0, 1, 1], [], []>} : vector<128x128xbf16>, vector<128x128xbf16>, vector<128x128xf32> -> vector<128x128xf32>
    %c0_17 = arith.constant 0 : index
    %c0_18 = arith.constant 0 : index
    %26 = vector.load %arg8[%c0_17, %c0_18] : memref<1x128xf32, #tpu.memory_space<vmem>>, vector<1x128xf32>
    %27 = vector.broadcast %26 : vector<1x128xf32> to vector<128x128xf32>
    %28 = arith.addf %25, %27 : vector<128x128xf32>
    %cst_19 = arith.constant 0.000000e+00 : f32
    %29 = vector.broadcast %cst_19 : f32 to vector<128x128xf32>
    %30 = arith.maximumf %28, %29 : vector<128x128xf32>
    %31 = arith.truncf %30 : vector<128x128xf32> to vector<128x128xbf16>
    %c0_20 = arith.constant 0 : index
    %c0_21 = arith.constant 0 : index
    %32 = vector.load %arg9[%c0_20, %c0_21] : memref<128x128xbf16, #tpu.memory_space<vmem>>, vector<128x128xbf16>
    %cst_22 = arith.constant dense<0.000000e+00> : vector<128x128xf32>
    %33 = tpu.matmul %31, %32, %cst_22 {dimension_numbers = #tpu.dot_dimension_numbers<[1], [0], [0], [1], [0, 0, 1, 1], [], []>} : vector<128x128xbf16>, vector<128x128xbf16>, vector<128x128xf32> -> vector<128x128xf32>
    %c0_23 = arith.constant 0 : index
    %c0_24 = arith.constant 0 : index
    %34 = vector.load %arg10[%c0_23, %c0_24] : memref<1x128xf32, #tpu.memory_space<vmem>>, vector<1x128xf32>
    %35 = vector.broadcast %34 : vector<1x128xf32> to vector<128x128xf32>
    %36 = arith.addf %33, %35 : vector<128x128xf32>
    %37 = arith.negf %36 : vector<128x128xf32>
    %38 = math.exp %37 : vector<128x128xf32>
    %cst_25 = arith.constant 1.000000e+00 : f32
    %39 = vector.broadcast %cst_25 : f32 to vector<128x128xf32>
    %40 = arith.addf %39, %38 : vector<128x128xf32>
    %41 = arith.divf %39, %40 : vector<128x128xf32>
    %c0_26 = arith.constant 0 : index
    %c0_27 = arith.constant 0 : index
    %42 = vector.load %arg11[%c0_26, %c0_27] : memref<128x128xf32, #tpu.memory_space<vmem>>, vector<128x128xf32>
    tpu.vector_store %arg11[%c0_26, %c0_27], %41 {strides = array<i32>} : memref<128x128xf32, #tpu.memory_space<vmem>>, vector<128x128xf32>,
    return
  }
  func.func @transform_0(%arg0: i32) -> (i32, i32) {
    %c0_i32 = arith.constant 0 : i32
    %c0_i32_0 = arith.constant 0 : i32
    return %arg0, %c0_i32 : i32, i32
  }
  func.func @transform_1(%arg0: i32) -> (i32, i32) {
    %c0_i32 = arith.constant 0 : i32
    %c0_i32_0 = arith.constant 0 : i32
    return %arg0, %c0_i32 : i32, i32
  }
  func.func @transform_2(%arg0: i32) -> (i32, i32) {
    %c0_i32 = arith.constant 0 : i32
    %c0_i32_0 = arith.constant 0 : i32
    %c0_i32_1 = arith.constant 0 : i32
    return %c0_i32, %c0_i32_0 : i32, i32
  }
  func.func @transform_3(%arg0: i32) -> (i32, i32) {
    %c0_i32 = arith.constant 0 : i32
    %c0_i32_0 = arith.constant 0 : i32
    %c0_i32_1 = arith.constant 0 : i32
    return %c0_i32, %c0_i32_0 : i32, i32
  }
  func.func @transform_4(%arg0: i32) -> (i32, i32) {
    %c0_i32 = arith.constant 0 : i32
    %c0_i32_0 = arith.constant 0 : i32
    %c0_i32_1 = arith.constant 0 : i32
    return %c0_i32, %c0_i32_0 : i32, i32
  }
  func.func @transform_5(%arg0: i32) -> (i32, i32) {
    %c0_i32 = arith.constant 0 : i32
    %c0_i32_0 = arith.constant 0 : i32
    %c0_i32_1 = arith.constant 0 : i32
    return %c0_i32, %c0_i32_0 : i32, i32
  }
  func.func @transform_6(%arg0: i32) -> (i32, i32) {
    %c0_i32 = arith.constant 0 : i32
    %c0_i32_0 = arith.constant 0 : i32
    %c0_i32_1 = arith.constant 0 : i32
    return %c0_i32, %c0_i32_0 : i32, i32
  }
  func.func @transform_7(%arg0: i32) -> (i32, i32) {
    %c0_i32 = arith.constant 0 : i32
    %c0_i32_0 = arith.constant 0 : i32
    %c0_i32_1 = arith.constant 0 : i32
    return %c0_i32, %c0_i32_0 : i32, i32
  }
  func.func @transform_8(%arg0: i32) -> (i32, i32) {
    %c0_i32 = arith.constant 0 : i32
    %c0_i32_0 = arith.constant 0 : i32
    %c0_i32_1 = arith.constant 0 : i32
    return %c0_i32, %c0_i32_0 : i32, i32
  }
  func.func @transform_9(%arg0: i32) -> (i32, i32) {
    %c0_i32 = arith.constant 0 : i32
    %c0_i32_0 = arith.constant 0 : i32
    %c0_i32_1 = arith.constant 0 : i32
    return %c0_i32, %c0_i32_0 : i32, i32
  }
  func.func @transform_10(%arg0: i32) -> (i32, i32) {
    %c0_i32 = arith.constant 0 : i32
    %c0_i32_0 = arith.constant 0 : i32
    return %arg0, %c0_i32 : i32, i32
  }
}

</mosaic_0001>

<bundles_post_ra>
// kernel: tpu_custom_call.1
= control target key start
LH: loop header
LB: loop body
LE: loop exit
PB: predicated region body
PF: predicated region fallthrough
CT: control target
= control target key end

     0   :  { %s2984_s0 = inlined_call_operand.hbm [shape: f32[256,128], index: 0, kind: input, shape index: {}]   ;;  %s2985_s1 = inlined_call_operand.hbm [shape: f32[256,128], index: 1, kind: input, shape index: {}]   ;;  %s2986_s2 = inlined_call_operand.hbm [shape: bf16[128,128], index: 2, kind: input, shape index: {}]   ;;  %s2987_s3 = inlined_call_operand.vmem [shape: f32[1,128], index: 3, kind: input, shape index: {}]   ;;  %s2988_s4 = inlined_call_operand.hbm [shape: bf16[128,256], index: 4, kind: input, shape index: {}]   ;;  %s2989_s5 = inlined_call_operand.vmem [shape: f32[1,256], index: 5, kind: input, shape index: {}]   ;;  %s2990_s6 = inlined_call_operand.hbm [shape: bf16[128,128], index: 6, kind: input, shape index: {}]   ;;  %s2991_s7 = inlined_call_operand.vmem [shape: f32[1,128], index: 7, kind: input, shape index: {}]   ;;  %s2992_s8 = inlined_call_operand.hbm [shape: bf16[128,128], index: 8, kind: input, shape index: {}]   ;;  %s2993_s9 = inlined_call_operand.vmem [shape: f32[1,128], index: 9, kind: input, shape index: {}]   ;;  %s2994_s10 = inlined_call_operand.hbm [shape: f32[256,128], index: 10, kind: output, shape index: {}]  }
   0x1   :  { %3009 = sst [smem:[#allocation22_spill]] %s2984_s0 }
   0x2   :  { %3010 = sst [smem:[#allocation23_spill]] %s2986_s2 }
   0x3   :  { %3011 = sst [smem:[#allocation24_spill]] %s2988_s4 }
   0x4   :  { %3012 = sst [smem:[#allocation25_spill]] %s2990_s6 }
   0x5   :  { %3013 = sst [smem:[#allocation26_spill]] %s2994_s10 }
   0x6   :  { %15 = vsyncpa [#allocation3], 0 }
   0x7   :  { %17 = vsyncpa [#allocation3 + $0x1], 0 }
   0x8   :  { %18 = vsyncpa [#allocation6], 0 }
   0x9   :  { %20 = vsyncpa [#allocation6 + $0x1], 0 }
   0xa   :  { %21 = vsyncpa [#allocation9], 0 }
   0xb   :  { %22 = vsyncpa [#allocation12], 0 }
   0xc   :  { %23 = vsyncpa [#allocation4], 0 }
   0xd   :  { %25 = vsyncpa [#allocation4 + $0x1], 0  ;;  %s2457_s13 = smov 0   ;;  %s2459_s14 = smov 0  }
   0xe   :  { %s2461_s15 = smov 0   ;;  %s2463_s16 = smov 0  }
   0xf LB: > { %3014 = sst [smem:[#allocation20_spill]] %s2374_s13  ;;  %s2478_s17 = sadd.s32 4294967295, %s2386_s16   ;;  %s2386_s16 = sphi %s2463_s16, %s3048_s16   ;;  %s2382_s15 = sphi %s2461_s15, %s3047_s15   ;;  %s2378_s14 = sphi %s2459_s14, %s3046_s14   ;;  %s2374_s13 = sphi %s2457_s13, %s3045_s13  }
  0x10   : > { %s1641_s18 = sadd.s32 4294967294, %s2386_s16   ;;  %p51_p0 = scmp.ne.s32.totalorder %s2378_s14, %s2374_s13 }
  0x11   : > { %p2995_p1 = scmp.eq.s32.totalorder %s2478_s17, 0  ;;  %p275_p3 = scmp.eq.s32.totalorder %s1641_s18, 1 }
  0x12   : > { %p1642_p5 = scmp.ge.s32.totalorder %s2386_s16, 1  ;;  %p282_p7 = scmp.lt.s32.totalorder %s2386_s16, 3 }
  0x13   : > { %p2487_p4 = por %p2995_p1, %p51_p0  ;;  %p2492_p6 = por %p275_p3, %p51_p0 }
  0x14   : > { %p2497_p8 = pnand %p1642_p5, %p282_p7  ;;  %s2388_s22 = smov [#allocation7]  }
  0x15   : > { %s3015_s19 = scalar_select %p2487_p4, 1, 0 }
  0x16   : > { %s3016_s20 = scalar_select %p2492_p6, 1, 0 }
  0x17   : > { %s3018_s21 = scalar_select %p2497_p8, 1, 0 }
  0x18   : > { %3017 = sst [smem:[#allocation21_spill]] %s3016_s20  ;;  %s294_s23 = sshll.u32 %s2388_s22, 4  ;;  %s2501_s23 = int_to_ptr.vmem [resolvable:$true] %s294_s23 }
  0x19   : > { %p1911_p9 = pneg %p2497_p8  ;;  %s2389_s25 = smov [#allocation8]  }
  0x1a   : > { %s310_s26 = sshll.u32 %s2389_s25, 4  ;;  %s3020_s2 = sld [smem:[#allocation23_spill]]  ;;  %s2512_s26 = int_to_ptr.vmem [resolvable:$true] %s310_s26 }
  0x1b   : > { %p2508_p11 = pnand %p1911_p9, %p2995_p1 }
  0x1d   : > { %p2522_p13 = pneg %p2508_p11 }
  0x20   : > { %s2132_s29 = scalar_lea.hbm %s3020_s2, 1024 }
  0x21   : > { %p2133_p12 = scmp.ne.s32.totalorder %s3020_s2, %s2132_s29  ;;  %p2139_p5 = scmp.lt.u32.totalorder %s2132_s29, %s3020_s2 }
  0x23   : > { %p2135_p0 = pnand %p2522_p13, %p2133_p12 }
  0x25   : > { %p2136_p3 = pneg %p2135_p0 }
  0x27   : > { %p2141_p7 = pnand %p2139_p5, %p2136_p3 }
  0x29   : > { %2144 = shalt.err (!%p2141_p7)
}
  0x2a   : > { %s2145_s25 = scalar_lea.vmem %s2501_s23, 1024  ;;  %p2153_p2 = scmp.lt.s32.totalorder %s2501_s23, %s2501_s23 }
  0x2b   : > { %p2146_p9 = scmp.ne.s32.totalorder %s2501_s23, %s2145_s25  ;;  %p2154_p6 = scmp.lt.s32.totalorder %s2145_s25, %s2145_s25 }
  0x2d   : > { %p2148_p10 = pnand %p2146_p9, %p2522_p13  ;;  %p2155_p12 = por %p2154_p6, %p2153_p2 }
  0x2f   : > { %p2149_p1 = pneg %p2148_p10 }
  0x31   : > { %p2156_p0 = pnand %p2155_p12, %p2149_p1 }
  0x33   : > { %2159 = shalt.err (!%p2156_p0)
}
  0x34   : > { %s2999_s27 = smov 64   ;;  %s3001_s28 = smov 4  }
  0x35   : > { %1914 = dma.hbm_to_vmem [thread:$0]  (!%p2508_p11), %s3020_s2, 1024, %s2501_s23, [#allocation6], %s2999_s27, %s2999_s27, %s3001_s28  }
  0x36   : > { %s3022_s4 = sld [smem:[#allocation24_spill]] }
  0x3c   : > { %s2160_s22 = scalar_lea.hbm %s3022_s4, 2048 }
  0x3d   : > { %p2161_p1 = scmp.ne.s32.totalorder %s3022_s4, %s2160_s22  ;;  %p2167_p10 = scmp.lt.u32.totalorder %s2160_s22, %s3022_s4 }
  0x3f   : > { %p2163_p2 = pnand %p2161_p1, %p2522_p13 }
  0x41   : > { %p2164_p6 = pneg %p2163_p2 }
  0x43   : > { %p2169_p3 = pnand %p2167_p10, %p2164_p6 }
  0x45   : > { %2172 = shalt.err (!%p2169_p3)
}
  0x46   : > { %s2173_s23 = scalar_lea.vmem %s2512_s26, 2048  ;;  %p2181_p12 = scmp.lt.s32.totalorder %s2512_s26, %s2512_s26 }
  0x47   : > { %p2174_p5 = scmp.ne.s32.totalorder %s2512_s26, %s2173_s23  ;;  %p2182_p0 = scmp.lt.s32.totalorder %s2173_s23, %s2173_s23 }
  0x49   : > { %p2176_p7 = pnand %p2174_p5, %p2522_p13  ;;  %p2183_p1 = por %p2182_p0, %p2181_p12 }
  0x4b   : > { %p2177_p9 = pneg %p2176_p7 }
  0x4d   : > { %p2184_p2 = pnand %p2183_p1, %p2177_p9 }
  0x4f   : > { %2187 = shalt.err (!%p2184_p2)
}
  0x50   : > { %s3005_s20 = smov 128   ;;  %s3007_s10 = smov 8  }
  0x51   : > { %1917 = dma.hbm_to_vmem [thread:$0]  (!%p2508_p11), %s3022_s4, 2048, %s2512_s26, [#allocation9], %s3005_s20, %s3005_s20, %s3007_s10  }
  0x52   : > { %s2394_s30 = smov [#allocation10]   ;;  %s2395_s18 = smov [#allocation11]  }
  0x53   : > { %s326_s11 = sshll.u32 %s2394_s30, 4  ;;  %s342_s22 = sshll.u32 %s2395_s18, 4  ;;  %s327_s11 = int_to_ptr.vmem [resolvable:$true] %s326_s11  ;;  %s2572_s22 = int_to_ptr.vmem [resolvable:$true] %s342_s22 }
  0x54   : > { %s3023_s6 = sld [smem:[#allocation25_spill]] }
  0x5a   : > { %s2188_s27 = scalar_lea.hbm %s3023_s6, 1024 }
  0x5b   : > { %p2189_p6 = scmp.ne.s32.totalorder %s3023_s6, %s2188_s27  ;;  %p2195_p5 = scmp.lt.u32.totalorder %s2188_s27, %s3023_s6 }
  0x5d   : > { %p2191_p10 = pnand %p2189_p6, %p2522_p13 }
  0x5f   : > { %p2192_p3 = pneg %p2191_p10 }
  0x61   : > { %p2197_p7 = pnand %p2195_p5, %p2192_p3 }
  0x63   : > { %2200 = shalt.err (!%p2197_p7)
}
  0x64   : > { %s2201_s29 = scalar_lea.vmem %s327_s11, 1024  ;;  %p2209_p1 = scmp.lt.s32.totalorder %s327_s11, %s327_s11 }
  0x65   : > { %p2202_p9 = scmp.ne.s32.totalorder %s327_s11, %s2201_s29  ;;  %p2210_p2 = scmp.lt.s32.totalorder %s2201_s29, %s2201_s29 }
  0x67   : > { %p2204_p12 = pnand %p2202_p9, %p2522_p13  ;;  %p2211_p4 = por %p2210_p2, %p2209_p1 }
  0x69   : > { %p2205_p0 = pneg %p2204_p12 }
  0x6b   : > { %p2212_p8 = pnand %p2211_p4, %p2205_p0 }
  0x6d   : > { %2215 = shalt.err (!%p2212_p8)
}
  0x6e   : > { %s3024_s2 = smov 4   ;;  %s3025_s28 = smov 64  }
  0x6f   : > { %1920 = dma.hbm_to_vmem [thread:$0]  (!%p2508_p11), %s3023_s6, 1024, %s327_s11, [#allocation9], %s3025_s28, %s3025_s28, %s3024_s2  }
  0x70   : > { %s2216_s23 = scalar_lea.hbm %s2992_s8, 1024 }
  0x71   : > { %p2217_p6 = scmp.ne.s32.totalorder %s2992_s8, %s2216_s23  ;;  %p2223_p10 = scmp.lt.u32.totalorder %s2216_s23, %s2992_s8 }
  0x73   : > { %p2219_p4 = pnand %p2217_p6, %p2522_p13 }
  0x75   : > { %p2220_p8 = pneg %p2219_p4 }
  0x77   : > { %p2225_p3 = pnand %p2223_p10, %p2220_p8 }
  0x79   : > { %2228 = shalt.err (!%p2225_p3)
}
  0x7a   : > { %s2229_s11 = scalar_lea.vmem %s2572_s22, 1024  ;;  %p2237_p12 = scmp.lt.s32.totalorder %s2572_s22, %s2572_s22 }
  0x7b   : > { %p2230_p5 = scmp.ne.s32.totalorder %s2572_s22, %s2229_s11  ;;  %p2238_p0 = scmp.lt.s32.totalorder %s2229_s11, %s2229_s11 }
  0x7d   : > { %p2232_p7 = pnand %p2230_p5, %p2522_p13  ;;  %p2239_p1 = por %p2238_p0, %p2237_p12 }
  0x7f   : > { %p2233_p9 = pneg %p2232_p7 }
  0x81   : > { %p2240_p2 = pnand %p2239_p1, %p2233_p9 }
  0x83   : > { %2243 = shalt.err (!%p2240_p2)
}
  0x84   : > { %1923 = dma.hbm_to_vmem [thread:$0]  (!%p2508_p11), %s2992_s8, 1024, %s2572_s22, [#allocation12], %s3025_s28, %s3025_s28, %s3024_s2  }
  0x85   : > { %s2622_s24 = sadd.s32 1, %s2386_s16   ;;  %s38_s27 = sadd.s32 1, %s2382_s15 }
  0x86   : > { %s35_s12 = ssub.s32 %s2386_s16, %s2622_s24  ;;  %p45_p6 = scmp.ne.s32.totalorder %s2382_s15, %s2378_s14 }
  0x87   : > { %p36_p13 = scmp.eq.s32.totalorder %s35_s12, 0  ;;  %p46_p4 = scmp.eq.s32.totalorder %s2386_s16, 0 }
  0x88   : > { %p3026_p10 = scmp.eq.s32.totalorder %s2478_s17, 1  ;;  %p1939_p5 = scmp.lt.s32.totalorder %s2386_s16, 2 }
  0x89   : > { %s2631_s18 = scalar_select %p36_p13, %s2382_s15, %s38_s27  }
  0x8a   : > { %p47_p8 = por %p46_p4, %p45_p6  ;;  %p2635_p3 = por %p3026_p10, %p45_p6 }
  0x8b   : > { %s359_s23 = sand.u32 1, %s2382_s15   ;;  %s1726_s22 = sshll.u32 %s2386_s16, 11 }
  0x8c   : > { %s1648_s13 = sshll.u32 %s359_s23, 7  ;;  %s3028_s0 = sld [smem:[#allocation22_spill]] }
  0x8d   : > { %s363_s29 = scalar_lea.vmem [#allocation2], %s1648_s13  ;;  %p2649_p11 = pnand %p1939_p5, %p47_p8 }
  0x8e   : > { %s370_s11 = sshll.u32 %s363_s29, 4  ;;  %s2656_s27 = scalar_lea.hbm %s2985_s1, %s1726_s22  ;;  %s2647_s11 = int_to_ptr.vmem [resolvable:$true] %s370_s11 }
  0x8f   : > { %s384_s2 = scalar_lea.vmem [#allocation5], %s1648_s13  ;;  %s2660_s10 = scalar_lea.sflag [#allocation3], %s359_s23 }
  0x90   : > { %s2658_s28 = sshll.u32 %s384_s2, 4  ;;  %p2246_p9 = pneg %p2649_p11  ;;  %s2692_s28 = int_to_ptr.vmem [resolvable:$true] %s2658_s28 }
  0x92   : > { %s2645_s26 = scalar_lea.hbm %s3028_s0, %s1726_s22  ;;  %s2249_s30 = scalar_lea.hbm %s3028_s0, 4096 }
  0x93   : > { %s2244_s29 = scalar_lea.hbm %s2645_s26, 2048  ;;  %p2250_p1 = scmp.lt.u32.totalorder %s2645_s26, %s3028_s0 }
  0x94   : > { %p2245_p7 = scmp.ne.s32.totalorder %s2645_s26, %s2244_s29  ;;  %p2251_p2 = scmp.lt.u32.totalorder %s2249_s30, %s2244_s29 }
  0x95   : > { %p2253_p6 = scmp.lt.u32.totalorder %s2244_s29, %s2645_s26 }
  0x96   : > { %p2247_p12 = pnand %p2246_p9, %p2245_p7  ;;  %p2252_p13 = por %p2251_p2, %p2250_p1 }
  0x98   : > { %p2248_p0 = pneg %p2247_p12  ;;  %p2254_p4 = por %p2253_p6, %p2252_p13 }
  0x9a   : > { %p2255_p8 = pnand %p2254_p4, %p2248_p0 }
  0x9c   : > { %2258 = shalt.err (!%p2255_p8)
}
  0x9d   : > { %s2259_s23 = scalar_lea.vmem %s2647_s11, 2048  ;;  %s2396_s4 = smov [#allocation2]  }
  0x9e   : > { %p2260_p10 = scmp.ne.s32.totalorder %s2647_s11, %s2259_s23  ;;  %s2264_s6 = sshll.u32 %s2396_s4, 4  ;;  %s2265_s6 = int_to_ptr.vmem [resolvable:$false] %s2264_s6 }
  0x9f   : > { %s2266_s13 = scalar_lea.vmem %s2265_s6, 4096  ;;  %p2267_p12 = scmp.lt.s32.totalorder %s2647_s11, %s2265_s6 }
  0xa0   : > { %p2262_p5 = pnand %p2260_p10, %p2246_p9  ;;  %p2268_p1 = scmp.lt.s32.totalorder %s2266_s13, %s2259_s23 }
  0xa2   : > { %p2263_p7 = pneg %p2262_p5  ;;  %p2269_p2 = por %p2268_p1, %p2267_p12 }
  0xa4   : > { %p2270_p13 = pnand %p2269_p2, %p2263_p7 }
  0xa6   : > { %2273 = shalt.err (!%p2270_p13)
}
  0xa7   : > { %s3030_s2 = smov 8   ;;  %s3031_s29 = smov 128  }
  0xa8   : > { %1927 = dma.hbm_to_vmem [thread:$0]  (!%p2649_p11), %s2645_s26, 2048, %s2647_s11, %s2660_s10, %s3031_s29, %s3031_s29, %s3030_s2  }
  0xa9   : > { %s380_s30 = sand.u32 1, %s2386_s16   ;;  %s2274_s22 = scalar_lea.hbm %s2656_s27, 2048 }
  0xaa   : > { %s2695_s12 = scalar_lea.sflag [#allocation6], %s380_s30  ;;  %p2275_p0 = scmp.ne.s32.totalorder %s2656_s27, %s2274_s22 }
  0xab   : > { %s2279_s6 = scalar_lea.hbm %s2985_s1, 4096  ;;  %p2280_p8 = scmp.lt.u32.totalorder %s2656_s27, %s2985_s1 }
  0xac   : > { %p2277_p6 = pnand %p2275_p0, %p2246_p9  ;;  %p2281_p10 = scmp.lt.u32.totalorder %s2279_s6, %s2274_s22 }
  0xad   : > { %p2283_p7 = scmp.lt.u32.totalorder %s2274_s22, %s2656_s27 }
  0xae   : > { %p2278_p4 = pneg %p2277_p6  ;;  %p2282_p5 = por %p2281_p10, %p2280_p8 }
  0xb0   : > { %p2284_p12 = por %p2283_p7, %p2282_p5 }
  0xb2   : > { %p2285_p1 = pnand %p2284_p12, %p2278_p4 }
  0xb4   : > { %2288 = shalt.err (!%p2285_p1)
}
  0xb5   : > { %s2289_s10 = scalar_lea.vmem %s2692_s28, 2048  ;;  %s2397_s26 = smov [#allocation5]  }
  0xb6   : > { %p2290_p2 = scmp.ne.s32.totalorder %s2692_s28, %s2289_s10  ;;  %s2294_s11 = sshll.u32 %s2397_s26, 4  ;;  %s2295_s11 = int_to_ptr.vmem [resolvable:$false] %s2294_s11 }
  0xb7   : > { %s2296_s0 = scalar_lea.vmem %s2295_s11, 4096  ;;  %p2297_p6 = scmp.lt.s32.totalorder %s2692_s28, %s2295_s11 }
  0xb8   : > { %p2292_p13 = pnand %p2290_p2, %p2246_p9  ;;  %p2298_p8 = scmp.lt.s32.totalorder %s2296_s0, %s2289_s10 }
  0xba   : > { %p2293_p0 = pneg %p2292_p13  ;;  %p2299_p10 = por %p2298_p8, %p2297_p6 }
  0xbc   : > { %p2300_p5 = pnand %p2299_p10, %p2293_p0 }
  0xbe   : > { %2303 = shalt.err (!%p2300_p5)
}
  0xbf   : > { %1930 = dma.hbm_to_vmem [thread:$0]  (!%p2649_p11), %s2656_s27, 2048, %s2692_s28, %s2695_s12, %s3031_s29, %s3031_s29, %s3030_s2  }
  0xc0   : > { %p3032_p9 = scmp.ne.s32.totalorder %s3018_s21, 0 }
  0xc1   : > { %s2727_s30 = sand.u32 (!%p3032_p9), 1, %s2378_s14   ;;  %p3033_p4 = scmp.ne.s32.totalorder (!%p3032_p9), %s3015_s19, 0 }
  0xc2   : > { %403 = sbr.rel (%p3032_p9) target bundleno = 1246 (0x4de), region = 60  ;;  %s2730_s22 = sshll.u32 (!%p3032_p9), %s2727_s30, 7 }
  0xc3   : > { %s406_s20 = scalar_lea.sflag (!%p3032_p9), [#allocation3], %s2727_s30  ;;  %s2734_s23 = scalar_lea.vmem (!%p3032_p9), [#allocation2], %s2730_s22 }
  0xc9   : > { %2349 = dma.done.wait (%p3033_p4), %s406_s20, 2048  }
  0xca   : > { %2351 = vsyncadd (%p3033_p4), %s406_s20, 4294965248  ;;  %s414_s21 = sand.u32 1, %s2478_s17   ;;  %s2742_s28 = scalar_lea.vmem [#allocation5], %s2730_s22 }
  0xcb   : > { %s415_s27 = scalar_lea.sflag [#allocation6], %s414_s21 }
  0xcc   : > { %2353 = dma.done.wait (%p3033_p4), %s415_s27, 2048  }
  0xcd   : > { %2355 = vsyncadd (%p3033_p4), %s415_s27, 4294965248  ;;  %p3034_p11 = scmp.eq.s32.totalorder %s2478_s17, 0 }
  0xcf   : > { %2357 = dma.done.wait (%p3034_p11), [#allocation6], 1024   ;;  %p3035_p7 = pmov %p3034_p11 }
  0xd1   : > { %2359 = vsyncadd (%p3035_p7), [#allocation6], 4294966272  ;;  %p3036_p12 = pmov %p3035_p7 }
  0xd2   : > { %p3037_p1 = pmov %p3035_p7 }
  0xd3   : > { %2361 = dma.done.wait (%p3036_p12), [#allocation9], 3072  }
  0xd4   : > { %2363 = vsyncadd (%p3037_p1), [#allocation9], 4294964224  ;;  %p3038_p2 = pmov %p3037_p1 }
  0xd5   : > { %p3039_p13 = pmov %p3037_p1 }
  0xd6   : > { %2365 = dma.done.wait (%p3038_p2), [#allocation12], 1024  }
  0xd7   : > { %2367 = vsyncadd (%p3039_p13), [#allocation12], 4294966272  ;;  %v1988_v0 = vld [vmem:[#allocation7] sm:$0xff]   ;;  %v1989_v1 = vld [vmem:[#allocation7 + $0x8] sm:$0xff]   ;;  %v2398_v48 = vmov 0   ;;  %s2907_s26 = scalar_lea.vmem [#allocation13], %s2730_s22 }
  0xd8   : > { %1777 = vmatprep.subr.bf16.mxu0 %v1988_v0  ;;  %v1990_v2 = vld [vmem:[#allocation7 + $0x10] sm:$0xff]   ;;  %v1991_v3 = vld [vmem:[#allocation7 + $0x18] sm:$0xff]   ;;  %v480_v4 = vld [vmem:[%s2734_s23] sm:$0xff]  ;;  %836 = vmatprep.mubr.bf16.mxu1 %v2398_v48  ;;  %s1728_s11 = sshll.u32 %s2478_s17, 11  ;;  %s1507_s0 = sshll.u32 %s2907_s26, 4  ;;  %s2937_s0 = int_to_ptr.vmem [resolvable:$true] %s1507_s0 }
  0xd9   : > { %1778 = vmatpush3.bf16.msra.mxu0 %v1988_v0  ;;  %v481_v5 = vld [vmem:[%s2734_s23 + $0x8] sm:$0xff]  ;;  %v1992_v7 = vld [vmem:[#allocation7 + $0x20] sm:$0xff]   ;;  %v1999_v10 = vld [vmem:[#allocation8 + $0x14] ss:$8 sps:$4 sm:$0xff]   ;;  %s1494_s17 = scalar_lea.sflag [#allocation4], %s2727_s30  ;;  %s2304_s27 = scalar_lea.vmem %s2937_s0, 2048 }
  0xda   : > { %1779 = vmatprep.subr.bf16.mxu0 %v1989_v1  ;;  %v496_v6 = vpack.c.bf16 %v481_v5, %v480_v4  ;;  %v1996_v8 = vld [vmem:[#allocation8 + $0x4] ss:$8 sps:$4 sm:$0xff]   ;;  %v1998_v9 = vld [vmem:[#allocation8] ss:$8 sps:$4 sm:$0xff]   ;;  %v2001_v12 = vld [vmem:[#allocation8 + $0x10] ss:$8 sps:$4 sm:$0xff]   ;;  %p2305_p0 = scmp.ne.s32.totalorder %s2937_s0, %s2304_s27 }
  0xdb   : > { %v1993_v11 = vld [vmem:[#allocation7 + $0x28] sm:$0xff]   ;;  %804 = vmatprep.subr.bf16.mxu1 %v1996_v8  ;;  %v1994_v14 = vld [vmem:[#allocation7 + $0x30] sm:$0xff]   ;;  %v1995_v17 = vld [vmem:[#allocation7 + $0x38] sm:$0xff]  }
  0xdc   : > { %1793 = vmatprep.mubr.bf16.mxu0 %v496_v6  ;;  %805 = vmatpush1.bf16.msra.mxu1 %v1998_v9  ;;  %v2002_v13 = vld [vmem:[#allocation8 + $0x24] ss:$8 sps:$4 sm:$0xff]   ;;  %v2004_v15 = vld [vmem:[#allocation8 + $0x20] ss:$8 sps:$4 sm:$0xff]   ;;  %v2005_v16 = vld [vmem:[#allocation8 + $0x34] ss:$8 sps:$4 sm:$0xff]   ;;  %p2306_p6 = pnand %p2305_p0, %p2635_p3 }
  0xdd   : > { %1780 = vmatpush3.bf16.msra.mxu0 %v1989_v1  ;;  %806 = vmatprep.subr.bf16.mxu1 %v1999_v10  ;;  %v2007_v18 = vld [vmem:[#allocation8 + $0x30] ss:$8 sps:$4 sm:$0xff]   ;;  %v2008_v19 = vld [vmem:[#allocation8 + $0x44] ss:$8 sps:$4 sm:$0xff]   ;;  %v2010_v24 = vld [vmem:[#allocation8 + $0x40] ss:$8 sps:$4 sm:$0xff]  }
  0xde   : > { %1781 = vmatprep.subr.bf16.mxu0 %v1990_v2  ;;  %v482_v20 = vld [vmem:[%s2734_s23 + $0x10] sm:$0xff]  ;;  %v483_v21 = vld [vmem:[%s2734_s23 + $0x18] sm:$0xff]  ;;  %v484_v22 = vld [vmem:[%s2734_s23 + $0x20] sm:$0xff]  ;;  %p2307_p8 = pneg %p2306_p6 }
  0xdf   : > { %v485_v23 = vld [vmem:[%s2734_s23 + $0x28] sm:$0xff]  ;;  %v2011_v25 = vld [vmem:[#allocation8 + $0x54] ss:$8 sps:$4 sm:$0xff]   ;;  %v497_v26 = vpack.c.bf16 %v483_v21, %v482_v20  ;;  %v2013_v28 = vld [vmem:[#allocation8 + $0x50] ss:$8 sps:$4 sm:$0xff]  }
  0xe0   : > { %807 = vmatpush1.bf16.msra.mxu1 %v2001_v12  ;;  %v498_v27 = vpack.c.bf16 %v485_v23, %v484_v22  ;;  %v486_v29 = vld [vmem:[%s2734_s23 + $0x30] sm:$0xff]  ;;  %v487_v30 = vld [vmem:[%s2734_s23 + $0x38] sm:$0xff]  ;;  %v488_v31 = vld [vmem:[%s2734_s23 + $0x40] sm:$0xff] }
  0xe1   : > { %1782 = vmatpush3.bf16.msra.mxu0 %v1990_v2  ;;  %808 = vmatprep.subr.bf16.mxu1 %v2002_v13  ;;  %v489_v32 = vld [vmem:[%s2734_s23 + $0x48] sm:$0xff]  ;;  %v499_v33 = vpack.c.bf16 %v487_v30, %v486_v29  ;;  %v490_v35 = vld [vmem:[%s2734_s23 + $0x50] sm:$0xff]  ;;  %v491_v36 = vld [vmem:[%s2734_s23 + $0x58] sm:$0xff] }
  0xe2   : > { %1783 = vmatprep.subr.bf16.mxu0 %v1991_v3  ;;  %v500_v34 = vpack.c.bf16 %v489_v32, %v488_v31  ;;  %v492_v37 = vld [vmem:[%s2734_s23 + $0x60] sm:$0xff]  ;;  %v493_v38 = vld [vmem:[%s2734_s23 + $0x68] sm:$0xff]  ;;  %v501_v39 = vpack.c.bf16 %v491_v36, %v490_v35  ;;  %v494_v41 = vld [vmem:[%s2734_s23 + $0x70] sm:$0xff] }
  0xe3   : > { %v502_v40 = vpack.c.bf16 %v493_v38, %v492_v37  ;;  %v495_v42 = vld [vmem:[%s2734_s23 + $0x78] sm:$0xff]  ;;  %v2014_v44 = vld [vmem:[#allocation8 + $0x64] ss:$8 sps:$4 sm:$0xff]   ;;  %v2016_v45 = vld [vmem:[#allocation8 + $0x60] ss:$8 sps:$4 sm:$0xff]   ;;  %s3040_s23 = sld [smem:[#allocation26_spill]] }
  0xe4   : > { %809 = vmatpush1.bf16.msra.mxu1 %v2004_v15  ;;  %v503_v43 = vpack.c.bf16 %v495_v42, %v494_v41  ;;  %v2017_v46 = vld [vmem:[#allocation8 + $0x74] ss:$8 sps:$4 sm:$0xff]   ;;  %v2019_v47 = vld [vmem:[#allocation8 + $0x70] ss:$8 sps:$4 sm:$0xff]   ;;  %v1662_v49 = vld [vmem:[%s2987_s3] ss:$0 sm:$0xff] }
  0xe5   : > { %1784 = vmatpush3.bf16.msra.mxu0 %v1991_v3  ;;  %810 = vmatprep.subr.bf16.mxu1 %v2005_v16  ;;  %v2020_v42 = vld [vmem:[#allocation10] sm:$0xff]  }
  0xe6   : > { %1785 = vmatprep.subr.bf16.mxu0 %v1992_v7 }
  0xe8   : > { %811 = vmatpush1.bf16.msra.mxu1 %v2007_v18 }
  0xe9   : > { %1786 = vmatpush3.bf16.msra.mxu0 %v1992_v7  ;;  %812 = vmatprep.subr.bf16.mxu1 %v2008_v19  ;;  %s2935_s21 = scalar_lea.hbm %s3040_s23, %s1728_s11 }
  0xea   : > { %1787 = vmatprep.subr.bf16.mxu0 %v1993_v11 }
  0xec   : > { %813 = vmatpush1.bf16.msra.mxu1 %v2010_v24 }
  0xed   : > { %1788 = vmatpush3.bf16.msra.mxu0 %v1993_v11  ;;  %814 = vmatprep.subr.bf16.mxu1 %v2011_v25 }
  0xee   : > { %1789 = vmatprep.subr.bf16.mxu0 %v1994_v14 }
  0xf0   : > { %815 = vmatpush1.bf16.msra.mxu1 %v2013_v28 }
  0xf1   : > { %1790 = vmatpush3.bf16.msra.mxu0 %v1994_v14  ;;  %816 = vmatprep.subr.bf16.mxu1 %v2014_v44  ;;  %v2022_v44 = vld [vmem:[#allocation10 + $0x10] sm:$0xff]  }
  0xf2   : > { %1791 = vmatprep.subr.bf16.mxu0 %v1995_v17 }
  0xf4   : > { %817 = vmatpush1.bf16.msra.mxu1 %v2016_v45  ;;  %v2023_v45 = vld [vmem:[#allocation10 + $0x18] sm:$0xff]  }
  0xf5   : > { %1792 = vmatpush3.bf16.msra.mxu0 %v1995_v17  ;;  %818 = vmatprep.subr.bf16.mxu1 %v2017_v46  ;;  %v2024_v46 = vld [vmem:[#allocation10 + $0x20] sm:$0xff]  }
  0xf6   : > { %1809 = vmatprep.subr.bf16.mxu0 %v2020_v42 }
  0xf8   : > { %1794 = vmatmul.mubr.bf16.vlgmr.msra.gmra.mrb[0].mxu0 %v497_v26  ;;  %819 = vmatpush1.bf16.msra.mxu1 %v2019_v47  ;;  %v2025_v47 = vld [vmem:[#allocation10 + $0x28] sm:$0xff]  }
  0xf9   : > { %1797 = vmatprep.mubr.bf16.mxu0 %v498_v27  ;;  %1810 = vmatpush3.bf16.msra.mxu0 %v2020_v42 }
 0x100   : > { %1798 = vmatmul.mubr.bf16.gmra.mrb[4].mxu0 %v499_v33 }
 0x101   : > { %1801 = vmatprep.mubr.bf16.mxu0 %v500_v34 }
 0x108   : > { %1802 = vmatmul.mubr.bf16.gmra.mrb[8].mxu0 %v501_v39 }
 0x109   : > { %1805 = vmatprep.mubr.bf16.mxu0 %v502_v40 }
 0x110   : > { %1806 = vmatmul.mubr.bf16.gmra.mrb[12].mxu0 %v503_v43  ;;  %v2021_v43 = vld [vmem:[#allocation10 + $0x8] sm:$0xff]  }
 0x111   : > { %1811 = vmatprep.subr.bf16.mxu0 %v2021_v43 }
 0x112   : > { %1812 = vmatpush3.bf16.msra.mxu0 %v2021_v43 }
 0x113   : > { %1813 = vmatprep.subr.bf16.mxu0 %v2022_v44 }
 0x116   : > { %1814 = vmatpush3.bf16.msra.mxu0 %v2022_v44  ;;  %v968_v44 = vld [vmem:[%s2742_s28 + $0x18] sm:$0xff] }
 0x117   : > { %1815 = vmatprep.subr.bf16.mxu0 %v2023_v45 }
 0x11a   : > { %1816 = vmatpush3.bf16.msra.mxu0 %v2023_v45 }
 0x11b   : > { %1817 = vmatprep.subr.bf16.mxu0 %v2024_v46 }
 0x11e   : > { %1818 = vmatpush3.bf16.msra.mxu0 %v2024_v46 }
 0x11f   : > { %1819 = vmatprep.subr.bf16.mxu0 %v2025_v47 }
 0x122   : > { %1820 = vmatpush3.bf16.msra.mxu0 %v2025_v47 }
 0x1cb   : > { %v1795_v50 = vpop.f32.mrb[0].mxu0 }
 0x1cc   : > { %v618_v51 = vadd.f32 %v1795_v50, %v1662_v49  ;;  %v609_v52 = vpop.f32.mrb[1].mxu0  ;;  %v2787_v50 = vld [vmem:[#allocation11] sm:$0xff]  }
 0x1cd   : > { %v610_v53 = vadd.f32 %v1662_v49, %v609_v52  ;;  %v1796_v54 = vpop.f32.mrb[2].mxu0  ;;  %1873 = vmatprep.subr.bf16.mxu1 %v2787_v50  ;;  %v2795_v52 = vld [vmem:[#allocation11 + $0x10] sm:$0xff]  }
 0x1ce   : > { %v621_v55 = vadd.f32 %v1796_v54, %v1662_v49  ;;  %v612_v56 = vpop.f32.mrb[3].mxu0  ;;  %v674_v58 = vmax.f32 %v618_v51, 0.0  ;;  %v2790_v51 = vld [vmem:[#allocation11 + $0x8] sm:$0xff]   ;;  %v2803_v54 = vld [vmem:[#allocation11 + $0x20] sm:$0xff]  }
 0x1cf   : > { %v613_v57 = vadd.f32 %v1662_v49, %v612_v56  ;;  %v672_v60 = vmax.f32 %v610_v53, 0.0  ;;  %v2799_v53 = vld [vmem:[#allocation11 + $0x18] sm:$0xff]   ;;  %v714_v56 = vlaneseq }
 0x1d0   : > { %v675_v59 = vmax.f32 %v621_v55, 0.0  ;;  %v2807_v55 = vld [vmem:[#allocation11 + $0x28] sm:$0xff]  }
 0x1d1   : > { %v673_v61 = vmax.f32 %v613_v57, 0.0  ;;  %v715_v57 = vshrl.u32 %v714_v56, 7 }
 0x1d2   : > { %v689_v62 = vpack.c.bf16 %v675_v59, %v674_v58  ;;  %v712_v59 = vld [vmem:[%s2989_s5] sm:$0x3] }
 0x1d3   : > { %v688_v63 = vpack.c.bf16 %v673_v61, %v672_v60  ;;  %v1799_v0 = vpop.f32.mrb[4].mxu0  ;;  %v720_v58 = vsub.s32 1, %v715_v57 }
 0x1d4   : > { %v634_v1 = vadd.f32 %v1799_v0, %v1662_v49  ;;  %v625_v2 = vpop.f32.mrb[5].mxu0 }
 0x1d5   : > { %837 = vmatmul.mubr.bf16.vlgmr.msra.gmra.mrb[0].mxu1 %v688_v63  ;;  %v626_v3 = vadd.f32 %v1662_v49, %v625_v2  ;;  %v1800_v4 = vpop.f32.mrb[6].mxu0  ;;  %v2815_v60 = vrot.slane %v712_v59, %v720_v58 }
 0x1d6   : > { %v678_v5 = vmax.f32 %v634_v1, 0.0  ;;  %v637_v6 = vadd.f32 %v1800_v4, %v1662_v49  ;;  %v628_v7 = vpop.f32.mrb[7].mxu0  ;;  %846 = vmatprep.mubr.bf16.mxu1 %v2398_v48  ;;  %1881 = vmatpush3.bf16.msra.mxu1 %v2787_v50 }
 0x1d7   : > { %v676_v8 = vmax.f32 %v626_v3, 0.0  ;;  %v629_v9 = vadd.f32 %v1662_v49, %v628_v7  ;;  %1874 = vmatprep.subr.bf16.mxu1 %v2790_v51 }
 0x1d8   : > { %v679_v10 = vmax.f32 %v637_v6, 0.0 }
 0x1d9   : > { %v677_v11 = vmax.f32 %v629_v9, 0.0 }
 0x1da   : > { %v691_v12 = vpack.c.bf16 %v679_v10, %v678_v5  ;;  %1882 = vmatpush3.bf16.msra.mxu1 %v2790_v51 }
 0x1db   : > { %v690_v13 = vpack.c.bf16 %v677_v11, %v676_v8  ;;  %v1803_v14 = vpop.f32.mrb[8].mxu0  ;;  %1875 = vmatprep.subr.bf16.mxu1 %v2795_v52  ;;  %v716_v11 = vsub.s32 0, %v715_v57 }
 0x1dc   : > { %v650_v15 = vadd.f32 %v1803_v14, %v1662_v49  ;;  %v641_v16 = vpop.f32.mrb[9].mxu0 }
 0x1dd   : > { %847 = vmatmul.mubr.bf16.gmra.mrb[4].mxu1 %v689_v62  ;;  %v642_v17 = vadd.f32 %v1662_v49, %v641_v16  ;;  %v1804_v18 = vpop.f32.mrb[10].mxu0 }
 0x1de   : > { %856 = vmatprep.mubr.bf16.mxu1 %v2398_v48  ;;  %v682_v19 = vmax.f32 %v650_v15, 0.0  ;;  %v653_v20 = vadd.f32 %v1804_v18, %v1662_v49  ;;  %v644_v21 = vpop.f32.mrb[11].mxu0  ;;  %1883 = vmatpush3.bf16.msra.mxu1 %v2795_v52 }
 0x1df   : > { %v680_v22 = vmax.f32 %v642_v17, 0.0  ;;  %v645_v23 = vadd.f32 %v1662_v49, %v644_v21  ;;  %1876 = vmatprep.subr.bf16.mxu1 %v2799_v53  ;;  %v2821_v17 = vrot.slane %v712_v59, %v716_v11 }
 0x1e0   : > { %v683_v24 = vmax.f32 %v653_v20, 0.0  ;;  %v965_v20 = vld [vmem:[%s2742_s28] sm:$0xff] }
 0x1e1   : > { %v681_v25 = vmax.f32 %v645_v23, 0.0 }
 0x1e2   : > { %v693_v26 = vpack.c.bf16 %v683_v24, %v682_v19  ;;  %1884 = vmatpush3.bf16.msra.mxu1 %v2799_v53 }
 0x1e3   : > { %v692_v27 = vpack.c.bf16 %v681_v25, %v680_v22  ;;  %v1807_v28 = vpop.f32.mrb[12].mxu0  ;;  %1877 = vmatprep.subr.bf16.mxu1 %v2803_v54  ;;  %v966_v25 = vld [vmem:[%s2742_s28 + $0x8] sm:$0xff] }
 0x1e4   : > { %v666_v29 = vadd.f32 %v1807_v28, %v1662_v49  ;;  %v657_v30 = vpop.f32.mrb[13].mxu0 }
 0x1e5   : > { %857 = vmatmul.mubr.bf16.gmra.mrb[8].mxu1 %v690_v13  ;;  %v658_v31 = vadd.f32 %v1662_v49, %v657_v30  ;;  %v1808_v32 = vpop.f32.mrb[14].mxu0 }
 0x1e6   : > { %866 = vmatprep.mubr.bf16.mxu1 %v2398_v48  ;;  %v686_v33 = vmax.f32 %v666_v29, 0.0  ;;  %v669_v34 = vadd.f32 %v1808_v32, %v1662_v49  ;;  %v660_v35 = vpop.f32.mrb[15].mxu0  ;;  %1885 = vmatpush3.bf16.msra.mxu1 %v2803_v54 }
 0x1e7   : > { %v684_v36 = vmax.f32 %v658_v31, 0.0  ;;  %v661_v37 = vadd.f32 %v1662_v49, %v660_v35  ;;  %v2027_v49 = vld [vmem:[#allocation10 + $0x38] sm:$0xff]   ;;  %1878 = vmatprep.subr.bf16.mxu1 %v2807_v55 }
 0x1e8   : > { %v687_v38 = vmax.f32 %v669_v34, 0.0 }
 0x1e9   : > { %v685_v39 = vmax.f32 %v661_v37, 0.0 }
 0x1ea   : > { %v695_v40 = vpack.c.bf16 %v687_v38, %v686_v33  ;;  %1886 = vmatpush3.bf16.msra.mxu1 %v2807_v55  ;;  %v967_v38 = vld [vmem:[%s2742_s28 + $0x10] sm:$0xff] }
 0x1eb   : > { %v694_v41 = vpack.c.bf16 %v685_v39, %v684_v36 }
 0x1ed   : > { %867 = vmatmul.mubr.bf16.gmra.mrb[12].mxu1 %v691_v12 }
 0x1ee   : > { %876 = vmatprep.mubr.bf16.mxu1 %v2398_v48 }
 0x1f5   : > { %877 = vmatmul.mubr.bf16.gmra.mrb[16].mxu1 %v692_v27 }
 0x1f6   : > { %886 = vmatprep.mubr.bf16.mxu1 %v2398_v48 }
 0x1fd   : > { %887 = vmatmul.mubr.bf16.gmra.mrb[20].mxu1 %v693_v26 }
 0x1fe   : > { %896 = vmatprep.mubr.bf16.mxu1 %v2398_v48 }
 0x205   : > { %897 = vmatmul.mubr.bf16.gmra.mrb[24].mxu1 %v694_v41 }
 0x206   : > { %906 = vmatprep.mubr.bf16.mxu1 %v2398_v48  ;;  %v2026_v48 = vld [vmem:[#allocation10 + $0x30] sm:$0xff]  }
 0x207   : > { %1821 = vmatprep.subr.bf16.mxu0 %v2026_v48 }
 0x208   : > { %1822 = vmatpush3.bf16.msra.mxu0 %v2026_v48 }
 0x209   : > { %1823 = vmatprep.subr.bf16.mxu0 %v2027_v49 }
 0x20c   : > { %1824 = vmatpush3.bf16.msra.mxu0 %v2027_v49 }
 0x20d   : > { %907 = vmatmul.mubr.bf16.gmra.mrb[28].mxu1 %v695_v40  ;;  %1841 = vmatprep.subr.bf16.mxu0 %v2787_v50 }
 0x2a8   : > { %v838_v61 = vpop.f32.mrb[0].mxu1 }
 0x2a9   : > { %v840_v62 = vpop.f32.mrb[1].mxu1  ;;  %v839_v26 = vadd.f32 %v838_v61, %v2821_v17 }
 0x2aa   : > { %v841_v63 = vadd.f32 %v840_v62, %v2815_v60  ;;  %v842_v0 = vpop.f32.mrb[2].mxu1 }
 0x2ab   : > { %v844_v1 = vpop.f32.mrb[3].mxu1  ;;  %v843_v32 = vadd.f32 %v842_v0, %v2821_v17 }
 0x2ac   : > { %v917_v2 = vmul.f32 0.5, %v841_v63  ;;  %v845_v3 = vadd.f32 %v844_v1, %v2815_v60 }
 0x2ae   : > { %v933_v4 = vmul.f32 1.442695, %v917_v2  ;;  %v918_v5 = vmul.f32 0.5, %v845_v3 }
 0x2b0   : > { %2036 = vpow2.f32 %v933_v4  ;;  %v935_v6 = vmul.f32 1.442695, %v918_v5  ;;  %v848_v7 = vpop.f32.mrb[4].mxu1  ;;  %v969_v4 = vld [vmem:[%s2742_s28 + $0x20] sm:$0xff] }
 0x2b1   : > { %v850_v8 = vpop.f32.mrb[5].mxu1  ;;  %v849_v47 = vadd.f32 %v848_v7, %v2821_v17 }
 0x2b2   : > { %2038 = vpow2.f32 %v935_v6  ;;  %v851_v9 = vadd.f32 %v850_v8, %v2815_v60  ;;  %v852_v10 = vpop.f32.mrb[6].mxu1 }
 0x2b3   : > { %v854_v12 = vpop.f32.mrb[7].mxu1  ;;  %v853_v59 = vadd.f32 %v852_v10, %v2821_v17  ;;  %v970_v10 = vld [vmem:[%s2742_s28 + $0x28] sm:$0xff] }
 0x2b4   : > { %v919_v13 = vmul.f32 0.5, %v851_v9  ;;  %v855_v14 = vadd.f32 %v854_v12, %v2815_v60 }
 0x2b6   : > { %v937_v15 = vmul.f32 1.442695, %v919_v13  ;;  %v920_v16 = vmul.f32 0.5, %v855_v14 }
 0x2b8   : > { %2040 = vpow2.f32 %v937_v15  ;;  %v939_v18 = vmul.f32 1.442695, %v920_v16  ;;  %v858_v19 = vpop.f32.mrb[8].mxu1 }
 0x2b9   : > { %v860_v21 = vpop.f32.mrb[9].mxu1  ;;  %v859_v11 = vadd.f32 %v858_v19, %v2821_v17 }
 0x2ba   : > { %v2037_v22 = vpop.eup %2036  ;;  %2042 = vpow2.f32 %v939_v18  ;;  %v861_v23 = vadd.f32 %v860_v21, %v2815_v60  ;;  %v862_v24 = vpop.f32.mrb[10].mxu1 }
 0x2bb   : > { %v864_v27 = vpop.f32.mrb[11].mxu1  ;;  %v981_v28 = vmul.f32 %v2037_v22, %v965_v20  ;;  %v863_v18 = vadd.f32 %v862_v24, %v2821_v17 }
 0x2bc   : > { %v2039_v29 = vpop.eup %2038  ;;  %v921_v30 = vmul.f32 0.5, %v861_v23  ;;  %v865_v31 = vadd.f32 %v864_v27, %v2815_v60  ;;  %v971_v27 = vld [vmem:[%s2742_s28 + $0x30] sm:$0xff] }
 0x2bd   : > { %v982_v33 = vmul.f32 %v2039_v29, %v966_v25  ;;  %v997_v34 = vadd.f32 %v981_v28, %v839_v26 }
 0x2be   : > { %v941_v35 = vmul.f32 1.442695, %v921_v30  ;;  %v922_v36 = vmul.f32 0.5, %v865_v31  ;;  %v972_v31 = vld [vmem:[%s2742_s28 + $0x38] sm:$0xff] }
 0x2bf   : > { %v998_v37 = vadd.f32 %v982_v33, %v843_v32 }
 0x2c0   : > { %2044 = vpow2.f32 %v941_v35  ;;  %v943_v39 = vmul.f32 1.442695, %v922_v36  ;;  %v868_v40 = vpop.f32.mrb[12].mxu1 }
 0x2c1   : > { %v870_v41 = vpop.f32.mrb[13].mxu1  ;;  %v1013_v42 = vpack.c.bf16 %v998_v37, %v997_v34  ;;  %v869_v32 = vadd.f32 %v868_v40, %v2821_v17 }
 0x2c2   : > { %v2041_v43 = vpop.eup %2040  ;;  %2046 = vpow2.f32 %v943_v39  ;;  %v871_v45 = vadd.f32 %v870_v41, %v2815_v60  ;;  %v872_v46 = vpop.f32.mrb[14].mxu1 }
 0x2c3   : > { %v983_v48 = vmul.f32 %v2041_v43, %v967_v38  ;;  %v874_v49 = vpop.f32.mrb[15].mxu1  ;;  %1825 = vmatprep.mubr.bf16.mxu0 %v1013_v42  ;;  %v873_v37 = vadd.f32 %v872_v46, %v2821_v17 }
 0x2c4   : > { %v2043_v56 = vpop.eup %2042  ;;  %v923_v57 = vmul.f32 0.5, %v871_v45  ;;  %v875_v58 = vadd.f32 %v874_v49, %v2815_v60  ;;  %v973_v45 = vld [vmem:[%s2742_s28 + $0x40] sm:$0xff] }
 0x2c5   : > { %v984_v61 = vmul.f32 %v2043_v56, %v968_v44  ;;  %v999_v62 = vadd.f32 %v983_v48, %v849_v47  ;;  %v974_v56 = vld [vmem:[%s2742_s28 + $0x48] sm:$0xff] }
 0x2c6   : > { %v945_v63 = vmul.f32 1.442695, %v923_v57  ;;  %v924_v0 = vmul.f32 0.5, %v875_v58 }
 0x2c7   : > { %v1000_v1 = vadd.f32 %v984_v61, %v853_v59 }
 0x2c8   : > { %2048 = vpow2.f32 %v945_v63  ;;  %v947_v2 = vmul.f32 1.442695, %v924_v0  ;;  %v2835_v3 = vpop.f32.mrb[16].mxu1 }
 0x2c9   : > { %v880_v5 = vpop.f32.mrb[17].mxu1  ;;  %v1014_v6 = vpack.c.bf16 %v1000_v1, %v999_v62  ;;  %v879_v57 = vadd.f32 %v2835_v3, %v2821_v17 }
 0x2ca   : > { %v2045_v7 = vpop.eup %2044  ;;  %2050 = vpow2.f32 %v947_v2  ;;  %v881_v8 = vadd.f32 %v880_v5, %v2815_v60  ;;  %v2839_v9 = vpop.f32.mrb[18].mxu1 }
 0x2cb   : > { %v884_v12 = vpop.f32.mrb[19].mxu1  ;;  %1826 = vmatmul.mubr.bf16.vlgmr.msra.gmra.mrb[16].mxu0 %v1014_v6  ;;  %v985_v13 = vmul.f32 %v2045_v7, %v969_v4  ;;  %v883_v63 = vadd.f32 %v2839_v9, %v2821_v17  ;;  %v975_v7 = vld [vmem:[%s2742_s28 + $0x50] sm:$0xff] }
 0x2cc   : > { %v2047_v14 = vpop.eup %2046  ;;  %v925_v15 = vmul.f32 0.5, %v881_v8  ;;  %v885_v16 = vadd.f32 %v884_v12, %v2815_v60  ;;  %1842 = vmatpush3.bf16.msra.mxu0 %v2787_v50  ;;  %v976_v12 = vld [vmem:[%s2742_s28 + $0x58] sm:$0xff] }
 0x2cd   : > { %v986_v20 = vmul.f32 %v2047_v14, %v970_v10  ;;  %v1001_v21 = vadd.f32 %v985_v13, %v859_v11  ;;  %1843 = vmatprep.subr.bf16.mxu0 %v2790_v51 }
 0x2ce   : > { %v949_v22 = vmul.f32 1.442695, %v925_v15  ;;  %v926_v23 = vmul.f32 0.5, %v885_v16 }
 0x2cf   : > { %v1002_v19 = vadd.f32 %v986_v20, %v863_v18 }
 0x2d0   : > { %2052 = vpow2.f32 %v949_v22  ;;  %v951_v25 = vmul.f32 1.442695, %v926_v23  ;;  %v2847_v26 = vpop.f32.mrb[20].mxu1  ;;  %1844 = vmatpush3.bf16.msra.mxu0 %v2790_v51 }
 0x2d1   : > { %v890_v28 = vpop.f32.mrb[21].mxu1  ;;  %v1015_v29 = vpack.c.bf16 %v1002_v19, %v1001_v21  ;;  %1845 = vmatprep.subr.bf16.mxu0 %v2795_v52  ;;  %v889_v13 = vadd.f32 %v2847_v26, %v2821_v17  ;;  %v977_v26 = vld [vmem:[%s2742_s28 + $0x60] sm:$0xff] }
 0x2d2   : > { %v2049_v50 = vpop.eup %2048  ;;  %2054 = vpow2.f32 %v951_v25  ;;  %v891_v24 = vadd.f32 %v890_v28, %v2815_v60  ;;  %v2853_v30 = vpop.f32.mrb[22].mxu1 }
 0x2d3   : > { %v894_v33 = vpop.f32.mrb[23].mxu1  ;;  %1829 = vmatprep.mubr.bf16.mxu0 %v1015_v29  ;;  %v987_v34 = vmul.f32 %v2049_v50, %v971_v27  ;;  %v893_v20 = vadd.f32 %v2853_v30, %v2821_v17  ;;  %v978_v50 = vld [vmem:[%s2742_s28 + $0x68] sm:$0xff] }
 0x2d4   : > { %v2051_v35 = vpop.eup %2050  ;;  %v927_v36 = vmul.f32 0.5, %v891_v24  ;;  %v895_v51 = vadd.f32 %v894_v33, %v2815_v60  ;;  %1846 = vmatpush3.bf16.msra.mxu0 %v2795_v52 }
 0x2d5   : > { %v988_v38 = vmul.f32 %v2051_v35, %v972_v31  ;;  %v1003_v39 = vadd.f32 %v987_v34, %v869_v32  ;;  %1847 = vmatprep.subr.bf16.mxu0 %v2799_v53  ;;  %v979_v35 = vld [vmem:[%s2742_s28 + $0x70] sm:$0xff] }
 0x2d6   : > { %v953_v41 = vmul.f32 1.442695, %v927_v36  ;;  %v928_v42 = vmul.f32 0.5, %v895_v51 }
 0x2d7   : > { %v1004_v40 = vadd.f32 %v988_v38, %v873_v37  ;;  %v980_v37 = vld [vmem:[%s2742_s28 + $0x78] sm:$0xff]  ;;  %s2399_s28 = smov [#allocation13]  }
 0x2d8   : > { %2056 = vpow2.f32 %v953_v41  ;;  %v955_v43 = vmul.f32 1.442695, %v928_v42  ;;  %v898_v44 = vpop.f32.mrb[24].mxu1  ;;  %1848 = vmatpush3.bf16.msra.mxu0 %v2799_v53  ;;  %s2308_s19 = sshll.u32 %s2399_s28, 4  ;;  %s2309_s19 = int_to_ptr.vmem [resolvable:$false] %s2308_s19 }
 0x2d9   : > { %v900_v47 = vpop.f32.mrb[25].mxu1  ;;  %v1016_v48 = vpack.c.bf16 %v1004_v40, %v1003_v39  ;;  %1849 = vmatprep.subr.bf16.mxu0 %v2803_v54  ;;  %v899_v24 = vadd.f32 %v898_v44, %v2821_v17  ;;  %s2310_s2 = scalar_lea.vmem %s2309_s19, 4096  ;;  %p2311_p10 = scmp.lt.s32.totalorder %s2937_s0, %s2309_s19 }
 0x2da   : > { %v2053_v52 = vpop.eup %2052  ;;  %2058 = vpow2.f32 %v955_v43  ;;  %v901_v46 = vadd.f32 %v900_v47, %v2815_v60  ;;  %v902_v49 = vpop.f32.mrb[26].mxu1  ;;  %v2034_v47 = vld [vmem:[#allocation11 + $0x30] sm:$0xff]   ;;  %p2312_p5 = scmp.lt.s32.totalorder %s2310_s2, %s2304_s27 }
 0x2db   : > { %v904_v58 = vpop.f32.mrb[27].mxu1  ;;  %1830 = vmatmul.mubr.bf16.gmra.mrb[20].mxu0 %v1016_v48  ;;  %v989_v59 = vmul.f32 %v2053_v52, %v973_v45  ;;  %v903_v30 = vadd.f32 %v902_v49, %v2821_v17  ;;  %1879 = vmatprep.subr.bf16.mxu1 %v2034_v47  ;;  %v2035_v48 = vld [vmem:[#allocation11 + $0x38] sm:$0xff]   ;;  %v1687_v52 = vld [vmem:[%s2991_s7] ss:$0 sm:$0xff] }
 0x2dc   : > { %v2055_v61 = vpop.eup %2054  ;;  %v929_v62 = vmul.f32 0.5, %v901_v46  ;;  %v905_v53 = vadd.f32 %v904_v58, %v2815_v60  ;;  %1850 = vmatpush3.bf16.msra.mxu0 %v2803_v54  ;;  %1887 = vmatpush3.bf16.msra.mxu1 %v2034_v47  ;;  %p2313_p9 = por %p2312_p5, %p2311_p10 }
 0x2dd   : > { %v990_v0 = vmul.f32 %v2055_v61, %v974_v56  ;;  %v1005_v1 = vadd.f32 %v989_v59, %v879_v57  ;;  %1851 = vmatprep.subr.bf16.mxu0 %v2807_v55  ;;  %1880 = vmatprep.subr.bf16.mxu1 %v2035_v48 }
 0x2de   : > { %v957_v2 = vmul.f32 1.442695, %v929_v62  ;;  %v930_v3 = vmul.f32 0.5, %v905_v53  ;;  %p2314_p4 = pnand %p2313_p9, %p2307_p8 }
 0x2df   : > { %v1006_v4 = vadd.f32 %v990_v0, %v883_v63 }
 0x2e0   : > { %2060 = vpow2.f32 %v957_v2  ;;  %v959_v5 = vmul.f32 1.442695, %v930_v3  ;;  %v908_v6 = vpop.f32.mrb[28].mxu1  ;;  %1852 = vmatpush3.bf16.msra.mxu0 %v2807_v55  ;;  %1888 = vmatpush3.bf16.msra.mxu1 %v2035_v48 }
 0x2e1   : > { %v910_v8 = vpop.f32.mrb[29].mxu1  ;;  %v1017_v10 = vpack.c.bf16 %v1006_v4, %v1005_v1  ;;  %v909_v38 = vadd.f32 %v908_v6, %v2821_v17  ;;  %1853 = vmatprep.subr.bf16.mxu0 %v2034_v47 }
 0x2e2   : > { %v2057_v54 = vpop.eup %2056  ;;  %2062 = vpow2.f32 %v959_v5  ;;  %v911_v9 = vadd.f32 %v910_v8, %v2815_v60  ;;  %v912_v11 = vpop.f32.mrb[30].mxu1 }
 0x2e3   : > { %v914_v14 = vpop.f32.mrb[31].mxu1  ;;  %1833 = vmatprep.mubr.bf16.mxu0 %v1017_v10  ;;  %v991_v15 = vmul.f32 %v2057_v54, %v975_v7  ;;  %v913_v42 = vadd.f32 %v912_v11, %v2821_v17 }
 0x2e4   : > { %v2059_v16 = vpop.eup %2058  ;;  %v931_v18 = vmul.f32 0.5, %v911_v9  ;;  %v915_v55 = vadd.f32 %v914_v14, %v2815_v60  ;;  %1854 = vmatpush3.bf16.msra.mxu0 %v2034_v47 }
 0x2e5   : > { %v992_v21 = vmul.f32 %v2059_v16, %v976_v12  ;;  %v1007_v22 = vadd.f32 %v991_v15, %v889_v13  ;;  %1855 = vmatprep.subr.bf16.mxu0 %v2035_v48 }
 0x2e6   : > { %v961_v23 = vmul.f32 1.442695, %v931_v18  ;;  %v932_v19 = vmul.f32 0.5, %v915_v55 }
 0x2e7   : > { %v1008_v25 = vadd.f32 %v992_v21, %v893_v20 }
 0x2e8   : > { %2064 = vpow2.f32 %v961_v23  ;;  %v963_v27 = vmul.f32 1.442695, %v932_v19  ;;  %1856 = vmatpush3.bf16.msra.mxu0 %v2035_v48 }
 0x2e9   : > { %v1018_v28 = vpack.c.bf16 %v1008_v25, %v1007_v22 }
 0x2ea   : > { %v2061_v29 = vpop.eup %2060  ;;  %2066 = vpow2.f32 %v963_v27 }
 0x2eb   : > { %1834 = vmatmul.mubr.bf16.gmra.mrb[24].mxu0 %v1018_v28  ;;  %v993_v60 = vmul.f32 %v2061_v29, %v977_v26 }
 0x2ec   : > { %v2063_v31 = vpop.eup %2062 }
 0x2ed   : > { %v994_v32 = vmul.f32 %v2063_v31, %v978_v50  ;;  %v1009_v33 = vadd.f32 %v993_v60, %v899_v24 }
 0x2ef   : > { %v1010_v34 = vadd.f32 %v994_v32, %v903_v30 }
 0x2f1   : > { %v1019_v36 = vpack.c.bf16 %v1010_v34, %v1009_v33 }
 0x2f2   : > { %v2065_v51 = vpop.eup %2064 }
 0x2f3   : > { %1837 = vmatprep.mubr.bf16.mxu0 %v1019_v36  ;;  %v995_v39 = vmul.f32 %v2065_v51, %v979_v35 }
 0x2f4   : > { %v2067_v41 = vpop.eup %2066 }
 0x2f5   : > { %v996_v40 = vmul.f32 %v2067_v41, %v980_v37  ;;  %v1011_v43 = vadd.f32 %v995_v39, %v909_v38 }
 0x2f7   : > { %v1012_v44 = vadd.f32 %v996_v40, %v913_v42  ;;  %v2896_v42 = vld [vmem:[%s2993_s9] ss:$0 sm:$0xff] }
 0x2f9   : > { %v1020_v45 = vpack.c.bf16 %v1012_v44, %v1011_v43 }
 0x2fb   : > { %1838 = vmatmul.mubr.bf16.gmra.mrb[28].mxu0 %v1020_v45 }
 0x39e   : > { %v1827_v17 = vpop.f32.mrb[16].mxu0 }
 0x39f   : > { %v1135_v46 = vadd.f32 %v1827_v17, %v1687_v52  ;;  %v1126_v49 = vpop.f32.mrb[17].mxu0 }
 0x3a0   : > { %v1127_v56 = vadd.f32 %v1687_v52, %v1126_v49  ;;  %v1828_v57 = vpop.f32.mrb[18].mxu0 }
 0x3a1   : > { %v1138_v58 = vadd.f32 %v1828_v57, %v1687_v52  ;;  %v1129_v59 = vpop.f32.mrb[19].mxu0  ;;  %v1191_v62 = vmax.f32 %v1135_v46, 0.0 }
 0x3a2   : > { %v1130_v61 = vadd.f32 %v1687_v52, %v1129_v59  ;;  %v1189_v63 = vmax.f32 %v1127_v56, 0.0 }
 0x3a3   : > { %v1192_v53 = vmax.f32 %v1138_v58, 0.0 }
 0x3a4   : > { %v1190_v0 = vmax.f32 %v1130_v61, 0.0 }
 0x3a5   : > { %v1206_v1 = vpack.c.bf16 %v1192_v53, %v1191_v62 }
 0x3a6   : > { %v1205_v2 = vpack.c.bf16 %v1190_v0, %v1189_v63 }
 0x3a8   : > { %1857 = vmatprep.mubr.bf16.mxu0 %v1205_v2 }
 0x3a9   : > { %1858 = vmatmul.mubr.bf16.vlgmr.msra.gmra.mrb[32].mxu0 %v1206_v1 }
 0x3ae   : > { %v1831_v3 = vpop.f32.mrb[20].mxu0 }
 0x3af   : > { %v1151_v4 = vadd.f32 %v1831_v3, %v1687_v52  ;;  %v1142_v5 = vpop.f32.mrb[21].mxu0 }
 0x3b0   : > { %v1143_v6 = vadd.f32 %v1687_v52, %v1142_v5  ;;  %v1832_v7 = vpop.f32.mrb[22].mxu0 }
 0x3b1   : > { %v1154_v8 = vadd.f32 %v1832_v7, %v1687_v52  ;;  %v1145_v10 = vpop.f32.mrb[23].mxu0  ;;  %v1195_v9 = vmax.f32 %v1151_v4, 0.0 }
 0x3b2   : > { %v1146_v54 = vadd.f32 %v1687_v52, %v1145_v10  ;;  %v1193_v12 = vmax.f32 %v1143_v6, 0.0 }
 0x3b3   : > { %v1196_v11 = vmax.f32 %v1154_v8, 0.0 }
 0x3b4   : > { %v1194_v13 = vmax.f32 %v1146_v54, 0.0 }
 0x3b5   : > { %v1208_v14 = vpack.c.bf16 %v1196_v11, %v1195_v9 }
 0x3b6   : > { %v1207_v15 = vpack.c.bf16 %v1194_v13, %v1193_v12 }
 0x3b8   : > { %1861 = vmatprep.mubr.bf16.mxu0 %v1207_v15 }
 0x3b9   : > { %1862 = vmatmul.mubr.bf16.gmra.mrb[36].mxu0 %v1208_v14 }
 0x3be   : > { %v1835_v16 = vpop.f32.mrb[24].mxu0 }
 0x3bf   : > { %v1167_v18 = vadd.f32 %v1835_v16, %v1687_v52  ;;  %v1158_v55 = vpop.f32.mrb[25].mxu0 }
 0x3c0   : > { %v1159_v20 = vadd.f32 %v1687_v52, %v1158_v55  ;;  %v1836_v21 = vpop.f32.mrb[26].mxu0 }
 0x3c1   : > { %v1170_v22 = vadd.f32 %v1836_v21, %v1687_v52  ;;  %v1161_v23 = vpop.f32.mrb[27].mxu0  ;;  %v1199_v25 = vmax.f32 %v1167_v18, 0.0 }
 0x3c2   : > { %v1162_v19 = vadd.f32 %v1687_v52, %v1161_v23  ;;  %v1197_v26 = vmax.f32 %v1159_v20, 0.0 }
 0x3c3   : > { %v1200_v27 = vmax.f32 %v1170_v22, 0.0 }
 0x3c4   : > { %v1198_v28 = vmax.f32 %v1162_v19, 0.0 }
 0x3c5   : > { %v1210_v29 = vpack.c.bf16 %v1200_v27, %v1199_v25 }
 0x3c6   : > { %v1209_v50 = vpack.c.bf16 %v1198_v28, %v1197_v26 }
 0x3c8   : > { %1865 = vmatprep.mubr.bf16.mxu1 %v1209_v50 }
 0x3c9   : > { %1866 = vmatmul.mubr.bf16.vlgmr.msra.gmra.mrb[32].mxu1 %v1210_v29 }
 0x3ce   : > { %v1839_v24 = vpop.f32.mrb[28].mxu0 }
 0x3cf   : > { %v1183_v60 = vadd.f32 %v1839_v24, %v1687_v52  ;;  %v1174_v31 = vpop.f32.mrb[29].mxu0 }
 0x3d0   : > { %v1175_v30 = vadd.f32 %v1687_v52, %v1174_v31  ;;  %v1840_v32 = vpop.f32.mrb[30].mxu0 }
 0x3d1   : > { %v1186_v33 = vadd.f32 %v1840_v32, %v1687_v52  ;;  %v1177_v34 = vpop.f32.mrb[31].mxu0  ;;  %v1203_v36 = vmax.f32 %v1183_v60, 0.0 }
 0x3d2   : > { %v1178_v35 = vadd.f32 %v1687_v52, %v1177_v34  ;;  %v1201_v37 = vmax.f32 %v1175_v30, 0.0 }
 0x3d3   : > { %v1204_v51 = vmax.f32 %v1186_v33, 0.0 }
 0x3d4   : > { %v1202_v38 = vmax.f32 %v1178_v35, 0.0 }
 0x3d5   : > { %v1212_v39 = vpack.c.bf16 %v1204_v51, %v1203_v36 }
 0x3d6   : > { %v1211_v41 = vpack.c.bf16 %v1202_v38, %v1201_v37 }
 0x3d8   : > { %1869 = vmatprep.mubr.bf16.mxu1 %v1211_v41 }
 0x3d9   : > { %1870 = vmatmul.mubr.bf16.gmra.mrb[36].mxu1 %v1212_v39 }
 0x47c   : > { %v1859_v40 = vpop.f32.mrb[32].mxu0 }
 0x47d   : > { %v1327_v43 = vadd.f32 %v1859_v40, %v2896_v42  ;;  %v1318_v44 = vpop.f32.mrb[33].mxu0 }
 0x47e   : > { %v1319_v45 = vadd.f32 %v2896_v42, %v1318_v44  ;;  %v1860_v47 = vpop.f32.mrb[34].mxu0 }
 0x47f   : > { %v1707_v48 = vmul.f32 -1.442695, %v1327_v43  ;;  %v1330_v52 = vadd.f32 %v1860_v47, %v2896_v42  ;;  %v1321_v17 = vpop.f32.mrb[35].mxu0 }
 0x480   : > { %v1705_v46 = vmul.f32 -1.442695, %v1319_v45  ;;  %v1322_v49 = vadd.f32 %v2896_v42, %v1321_v17 }
 0x481   : > { %2068 = vpow2.f32 %v1707_v48  ;;  %v1708_v56 = vmul.f32 -1.442695, %v1330_v52 }
 0x482   : > { %2070 = vpow2.f32 %v1705_v46  ;;  %v1706_v57 = vmul.f32 -1.442695, %v1322_v49 }
 0x483   : > { %2072 = vpow2.f32 %v1708_v56 }
 0x484   : > { %2074 = vpow2.f32 %v1706_v57 }
 0x48b   : > { %v2069_v58 = vpop.eup %2068 }
 0x48c   : > { %v2071_v59 = vpop.eup %2070  ;;  %v1431_v61 = vadd.f32 1.0, %v2069_v58  ;;  %v1863_v62 = vpop.f32.mrb[36].mxu0 }
 0x48d   : > { %v2073_v53 = vpop.eup %2072  ;;  %v1429_v63 = vadd.f32 1.0, %v2071_v59  ;;  %v1343_v0 = vadd.f32 %v1863_v62, %v2896_v42  ;;  %v1334_v1 = vpop.f32.mrb[37].mxu0 }
 0x48e   : > { %v2075_v2 = vpop.eup %2074  ;;  %2076 = vrcp.f32 %v1431_v61  ;;  %v1432_v3 = vadd.f32 1.0, %v2073_v53  ;;  %v1335_v4 = vadd.f32 %v2896_v42, %v1334_v1  ;;  %v1864_v5 = vpop.f32.mrb[38].mxu0 }
 0x48f   : > { %2078 = vrcp.f32 %v1429_v63  ;;  %v1430_v6 = vadd.f32 1.0, %v2075_v2  ;;  %v1711_v7 = vmul.f32 -1.442695, %v1343_v0  ;;  %v1346_v8 = vadd.f32 %v1864_v5, %v2896_v42  ;;  %v1337_v10 = vpop.f32.mrb[39].mxu0 }
 0x490   : > { %2080 = vrcp.f32 %v1432_v3  ;;  %v1709_v54 = vmul.f32 -1.442695, %v1335_v4  ;;  %v1338_v9 = vadd.f32 %v2896_v42, %v1337_v10 }
 0x491   : > { %2082 = vrcp.f32 %v1430_v6  ;;  %v1712_v11 = vmul.f32 -1.442695, %v1346_v8 }
 0x492   : > { %2084 = vpow2.f32 %v1711_v7  ;;  %v1710_v12 = vmul.f32 -1.442695, %v1338_v9 }
 0x493   : > { %2086 = vpow2.f32 %v1709_v54 }
 0x494   : > { %2088 = vpow2.f32 %v1712_v11 }
 0x495   : > { %2090 = vpow2.f32 %v1710_v12 }
 0x498   : > { %v2077_v13 = vpop.eup %2076 }
 0x499   : > { %v2079_v14 = vpop.eup %2078  ;;  %1479 = vst [vmem:[%s2907_s26 + $0x10] sm:$0xff] %v2077_v13 }
 0x49a   : > { %v2081_v15 = vpop.eup %2080  ;;  %1477 = vst [vmem:[%s2907_s26] sm:$0xff] %v2079_v14 }
 0x49b   : > { %v2083_v16 = vpop.eup %2082  ;;  %1480 = vst [vmem:[%s2907_s26 + $0x18] sm:$0xff] %v2081_v15 }
 0x49c   : > { %v2085_v18 = vpop.eup %2084  ;;  %1478 = vst [vmem:[%s2907_s26 + $0x8] sm:$0xff] %v2083_v16  ;;  %v1867_v55 = vpop.f32.mrb[32].mxu1 }
 0x49d   : > { %v2087_v20 = vpop.eup %2086  ;;  %v1435_v21 = vadd.f32 1.0, %v2085_v18  ;;  %v1359_v22 = vadd.f32 %v1867_v55, %v2896_v42  ;;  %v1350_v23 = vpop.f32.mrb[33].mxu1 }
 0x49e   : > { %v2089_v19 = vpop.eup %2088  ;;  %v1433_v25 = vadd.f32 1.0, %v2087_v20  ;;  %v1351_v27 = vadd.f32 %v2896_v42, %v1350_v23  ;;  %v1868_v26 = vpop.f32.mrb[34].mxu1 }
 0x49f   : > { %v2091_v28 = vpop.eup %2090  ;;  %2092 = vrcp.f32 %v1435_v21  ;;  %v1436_v29 = vadd.f32 1.0, %v2089_v19  ;;  %v1715_v50 = vmul.f32 -1.442695, %v1359_v22  ;;  %v1362_v24 = vadd.f32 %v1868_v26, %v2896_v42  ;;  %v1353_v60 = vpop.f32.mrb[35].mxu1 }
 0x4a0   : > { %2094 = vrcp.f32 %v1433_v25  ;;  %v1434_v31 = vadd.f32 1.0, %v2091_v28  ;;  %v1713_v30 = vmul.f32 -1.442695, %v1351_v27  ;;  %v1354_v32 = vadd.f32 %v2896_v42, %v1353_v60 }
 0x4a1   : > { %2096 = vrcp.f32 %v1436_v29  ;;  %v1716_v33 = vmul.f32 -1.442695, %v1362_v24 }
 0x4a2   : > { %2098 = vrcp.f32 %v1434_v31  ;;  %v1714_v34 = vmul.f32 -1.442695, %v1354_v32 }
 0x4a3   : > { %2100 = vpow2.f32 %v1715_v50 }
 0x4a4   : > { %2102 = vpow2.f32 %v1713_v30 }
 0x4a5   : > { %2104 = vpow2.f32 %v1716_v33 }
 0x4a6   : > { %2106 = vpow2.f32 %v1714_v34 }
 0x4a9   : > { %v2093_v35 = vpop.eup %2092 }
 0x4aa   : > { %v2095_v36 = vpop.eup %2094  ;;  %1483 = vst [vmem:[%s2907_s26 + $0x30] sm:$0xff] %v2093_v35 }
 0x4ab   : > { %v2097_v51 = vpop.eup %2096  ;;  %1481 = vst [vmem:[%s2907_s26 + $0x20] sm:$0xff] %v2095_v36 }
 0x4ac   : > { %v2099_v37 = vpop.eup %2098  ;;  %1484 = vst [vmem:[%s2907_s26 + $0x38] sm:$0xff] %v2097_v51  ;;  %v1871_v38 = vpop.f32.mrb[36].mxu1 }
 0x4ad   : > { %v2101_v39 = vpop.eup %2100  ;;  %1482 = vst [vmem:[%s2907_s26 + $0x28] sm:$0xff] %v2099_v37  ;;  %v1375_v41 = vadd.f32 %v1871_v38, %v2896_v42  ;;  %v1366_v40 = vpop.f32.mrb[37].mxu1 }
 0x4ae   : > { %v2103_v43 = vpop.eup %2102  ;;  %v1439_v44 = vadd.f32 1.0, %v2101_v39  ;;  %v1367_v45 = vadd.f32 %v2896_v42, %v1366_v40  ;;  %v1872_v47 = vpop.f32.mrb[38].mxu1 }
 0x4af   : > { %v2105_v48 = vpop.eup %2104  ;;  %v1437_v52 = vadd.f32 1.0, %v2103_v43  ;;  %v1378_v17 = vadd.f32 %v1872_v47, %v2896_v42  ;;  %v1369_v46 = vpop.f32.mrb[39].mxu1  ;;  %v1719_v57 = vmul.f32 -1.442695, %v1375_v41 }
 0x4b0   : > { %v2107_v49 = vpop.eup %2106  ;;  %2108 = vrcp.f32 %v1439_v44  ;;  %v1440_v56 = vadd.f32 1.0, %v2105_v48  ;;  %v1370_v58 = vadd.f32 %v2896_v42, %v1369_v46  ;;  %v1717_v61 = vmul.f32 -1.442695, %v1367_v45 }
 0x4b1   : > { %2110 = vrcp.f32 %v1437_v52  ;;  %v1438_v59 = vadd.f32 1.0, %v2107_v49  ;;  %v1720_v62 = vmul.f32 -1.442695, %v1378_v17 }
 0x4b2   : > { %2112 = vrcp.f32 %v1440_v56  ;;  %v1718_v53 = vmul.f32 -1.442695, %v1370_v58 }
 0x4b3   : > { %2114 = vrcp.f32 %v1438_v59 }
 0x4b4   : > { %2116 = vpow2.f32 %v1719_v57 }
 0x4b5   : > { %2118 = vpow2.f32 %v1717_v61 }
 0x4b6   : > { %2120 = vpow2.f32 %v1720_v62 }
 0x4b7   : > { %2122 = vpow2.f32 %v1718_v53 }
 0x4ba   : > { %v2109_v63 = vpop.eup %2108 }
 0x4bb   : > { %v2111_v0 = vpop.eup %2110  ;;  %1487 = vst [vmem:[%s2907_s26 + $0x50] sm:$0xff] %v2109_v63 }
 0x4bc   : > { %v2113_v1 = vpop.eup %2112  ;;  %1485 = vst [vmem:[%s2907_s26 + $0x40] sm:$0xff] %v2111_v0 }
 0x4bd   : > { %v2115_v42 = vpop.eup %2114  ;;  %1488 = vst [vmem:[%s2907_s26 + $0x58] sm:$0xff] %v2113_v1 }
 0x4be   : > { %v2117_v2 = vpop.eup %2116  ;;  %1486 = vst [vmem:[%s2907_s26 + $0x48] sm:$0xff] %v2115_v42 }
 0x4bf   : > { %v2119_v3 = vpop.eup %2118  ;;  %v1443_v4 = vadd.f32 1.0, %v2117_v2 }
 0x4c0   : > { %v2121_v5 = vpop.eup %2120  ;;  %v1441_v6 = vadd.f32 1.0, %v2119_v3 }
 0x4c1   : > { %v2123_v7 = vpop.eup %2122  ;;  %2124 = vrcp.f32 %v1443_v4  ;;  %v1444_v8 = vadd.f32 1.0, %v2121_v5 }
 0x4c2   : > { %2126 = vrcp.f32 %v1441_v6  ;;  %v1442_v10 = vadd.f32 1.0, %v2123_v7 }
 0x4c3   : > { %2128 = vrcp.f32 %v1444_v8 }
 0x4c4   : > { %2130 = vrcp.f32 %v1442_v10 }
 0x4cb   : > { %v2125_v54 = vpop.eup %2124 }
 0x4cc   : > { %v2127_v9 = vpop.eup %2126  ;;  %1491 = vst [vmem:[%s2907_s26 + $0x70] sm:$0xff] %v2125_v54 }
 0x4cd   : > { %v2129_v11 = vpop.eup %2128  ;;  %1489 = vst [vmem:[%s2907_s26 + $0x60] sm:$0xff] %v2127_v9 }
 0x4ce   : > { %v2131_v12 = vpop.eup %2130  ;;  %1492 = vst [vmem:[%s2907_s26 + $0x78] sm:$0xff] %v2129_v11 }
 0x4cf   : > { %1490 = vst [vmem:[%s2907_s26 + $0x68] sm:$0xff] %v2131_v12 }
 0x4d0   : > { %2317 = shalt.err (!%p2314_p4)
}
 0x4d1   : > { %s2318_s29 = scalar_lea.hbm %s2935_s21, 2048  ;;  %s2322_s6 = scalar_lea.hbm %s3040_s23, 4096 }
 0x4d2   : > { %p2319_p11 = scmp.ne.s32.totalorder %s2935_s21, %s2318_s29  ;;  %p2323_p1 = scmp.lt.u32.totalorder %s2935_s21, %s3040_s23 }
 0x4d3   : > { %p2324_p2 = scmp.lt.u32.totalorder %s2322_s6, %s2318_s29  ;;  %p2326_p0 = scmp.lt.u32.totalorder %s2318_s29, %s2935_s21 }
 0x4d4   : > { %p2320_p7 = pnand %p2319_p11, %p2635_p3 }
 0x4d5   : > { %p2325_p13 = por %p2324_p2, %p2323_p1 }
 0x4d6   : > { %p2321_p12 = pneg %p2320_p7 }
 0x4d7   : > { %p2327_p6 = por %p2326_p0, %p2325_p13 }
 0x4d9   : > { %p2328_p8 = pnand %p2327_p6, %p2321_p12 }
 0x4db   : > { %2331 = shalt.err (!%p2328_p8)
}
 0x4dc   : > { %s2400_s26 = smov 128   ;;  %s2401_s11 = smov 8  }
 0x4dd   : > { %1909 = dma.vmem_to_hbm [thread:$0]  (%p2635_p3), %s2937_s0, 2048, %s2935_s21, %s1494_s17, %s2400_s26, %s2400_s26, %s2401_s11  }
 0x4de PF: > { %s3041_s22 = sld [smem:[#allocation20_spill]]  ;;  %s3042_s20 = sld [smem:[#allocation21_spill]] }
 0x4df   : > { %p3044_p5 = scmp.ge.s32.totalorder %s2386_s16, 2 }
 0x4e4   : > { %s1522_s27 = sand.u32 1, %s3041_s22   ;;  %p3043_p10 = scmp.ne.s32.totalorder %s3042_s20, 0 }
 0x4e5   : > { %s1523_s28 = scalar_lea.sflag [#allocation4], %s1522_s27 }
 0x4e6   : > { %p1932_p9 = pnand %p3044_p5, %p3043_p10 }
 0x4e8   : > { %2369 = dma.done.wait (!%p1932_p9), %s1523_s28, 2048  }
 0x4e9   : > { %2371 = vsyncadd (!%p1932_p9), %s1523_s28, 4294965248  ;;  %p28_p4 = scmp.ge.s32.totalorder %s2622_s24, 4   ;;  %s3045_s13 = smov %s2378_s14 }
 0x4ea   : > { %s3046_s14 = smov %s2382_s15  ;;  %s3047_s15 = smov %s2631_s18 }
 0x4eb   : > { %s3048_s16 = smov %s2622_s24  ;;  %30 = sbr.rel (!%p28_p4) target bundleno = 15 (0xf), region = 134 }
 0x4f2   :  { %1528 = vsyncpa [#allocation3], 1 }
 0x4f3   :  { %1530 = vsyncpa [#allocation3 + $0x1], 1 }
 0x4f4   :  { %1531 = vsyncpa [#allocation6], 1 }
 0x4f5   :  { %1533 = vsyncpa [#allocation6 + $0x1], 1 }
 0x4f6   :  { %1534 = vsyncpa [#allocation9], 1 }
 0x4f7   :  { %1535 = vsyncpa [#allocation12], 1 }
 0x4f8   :  { %1536 = vsyncpa [#allocation4], 1 }
 0x4f9   :  { %1538 = vsyncpa [#allocation4 + $0x1], 1 }

</bundles_post_ra>
